<compile_context>
chip_gen: v5e
topology: v5e:2x2
jax: 0.10.0
libtpu: 0.0.40
codegen_flags: <defaults>
</compile_context>

<pallas_src>
import numpy as np

import jax
import jax.numpy as jnp
from jax.experimental import pallas as pl
from jax.experimental.pallas import tpu as pltpu


# ------------------------------ fused kernel --------------------------------

def _lenet_kernel(x_ref, w1_ref, b1_ref, w2_ref, b2_ref,
                  sc1_ref, sr1_ref, sc2_ref, sr2_ref,
                  wf1_ref, bf1_ref, wf2_ref, bf2_ref, wc_ref, bc_ref,
                  o_ref):
    f32 = jnp.float32
    bf16 = jnp.bfloat16

    x = x_ref[0, 0]                                   # (28, 28) one image

    # conv1 (5x5 valid, 1->6) + bias + ReLU.  GEMM over Toeplitz-expanded
    # weights, accumulating over the 5 kernel-row offsets.
    acc1 = jnp.dot(x[0:24, :].astype(bf16), w1_ref[0], preferred_element_type=f32)
    for i in range(1, 5):
        acc1 = acc1 + jnp.dot(x[i:i + 24, :].astype(bf16), w1_ref[i],
                              preferred_element_type=f32)
    y1 = jnp.maximum(acc1 + b1_ref[...], 0.0)         # (24, 144), cols = w*6 + c

    # maxpool 2x2: exact 0/1 selection matmuls + elementwise max.
    c1 = jnp.maximum(jnp.dot(y1, sc1_ref[0], preferred_element_type=f32),
                     jnp.dot(y1, sc1_ref[1], preferred_element_type=f32))   # (24, 72)
    p1 = jnp.maximum(jnp.dot(sr1_ref[0], c1, preferred_element_type=f32),
                     jnp.dot(sr1_ref[1], c1, preferred_element_type=f32))   # (12, 72)

    # conv2 (5x5 valid, 6->16) + bias + ReLU.
    acc2 = jnp.dot(p1[0:8, :].astype(bf16), w2_ref[0], preferred_element_type=f32)
    for i in range(1, 5):
        acc2 = acc2 + jnp.dot(p1[i:i + 8, :].astype(bf16), w2_ref[i],
                              preferred_element_type=f32)
    y2 = jnp.maximum(acc2 + b2_ref[...], 0.0)         # (8, 128), cols = w*16 + c

    # maxpool 2x2.
    c2 = jnp.maximum(jnp.dot(y2, sc2_ref[0], preferred_element_type=f32),
                     jnp.dot(y2, sc2_ref[1], preferred_element_type=f32))   # (8, 64)
    p2 = jnp.maximum(jnp.dot(sr2_ref[0], c2, preferred_element_type=f32),
                     jnp.dot(sr2_ref[1], c2, preferred_element_type=f32))   # (4, 64)

    # fc1 (16*4*4 -> 120) + ReLU.  Contraction over the 4 pooled rows is split
    # into 4 matmuls against the pre-permuted weight slabs (PyTorch NCHW
    # flatten order already baked into wf1), so no in-kernel reshape is needed.
    f1 = jnp.dot(p2[0:1, :].astype(bf16), wf1_ref[0], preferred_element_type=f32)
    for h in range(1, 4):
        f1 = f1 + jnp.dot(p2[h:h + 1, :].astype(bf16), wf1_ref[h],
                          preferred_element_type=f32)
    h1 = jnp.maximum(f1 + bf1_ref[...], 0.0)          # (1, 120)

    # fc2 (120 -> embedding_dim) + ReLU.
    h2 = jnp.maximum(
        jnp.dot(h1.astype(bf16), wf2_ref[...], preferred_element_type=f32)
        + bf2_ref[...], 0.0)                          # (1, 84)

    # classifier head (Linear, no activation), padded to 128 lanes.
    logits = jnp.dot(h2.astype(bf16), wc_ref[...],
                     preferred_element_type=f32) + bc_ref[...]              # (1, 128)
    o_ref[0] = logits


# --------------------------- one-time weight packing -------------------------

def pack_params(params):
    """Pre-pack / pre-transpose / bf16-cast all weights once (outside jit)."""
    w1 = np.asarray(params["conv1_w"], np.float32)    # (6, 1, 5, 5)
    b1 = np.asarray(params["conv1_b"], np.float32)
    w2 = np.asarray(params["conv2_w"], np.float32)    # (16, 6, 5, 5)
    b2 = np.asarray(params["conv2_b"], np.float32)
    fw1 = np.asarray(params["fc1_w"], np.float32)     # (120, 256)
    fb1 = np.asarray(params["fc1_b"], np.float32)
    fw2 = np.asarray(params["fc2_w"], np.float32)     # (embed, 120)
    fb2 = np.asarray(params["fc2_b"], np.float32)
    cw = np.asarray(params["cls_w"], np.float32)      # (ncls, embed)
    cb = np.asarray(params["cls_b"], np.float32)

    K = 5
    C1, C2 = 6, 16          # conv output channels
    OW1, OW2 = 24, 8        # conv output widths
    PW1, PW2 = 12, 4        # pooled widths

    # conv1 Toeplitz weights: W1[i, w, ow*C1 + co] = w1[co, 0, i, w - ow]
    W1 = np.zeros((K, 28, OW1 * C1), np.float32)
    for i in range(K):
        for j in range(K):
            for ow in range(OW1):
                W1[i, ow + j, ow * C1:(ow + 1) * C1] = w1[:, 0, i, j]
    B1 = np.tile(b1, OW1)[None, :]                    # (1, 144)

    # conv2 Toeplitz weights: W2[i, w*C1 + ci, ow*C2 + co] = w2[co, ci, i, w - ow]
    W2 = np.zeros((K, PW1 * C1, OW2 * C2), np.float32)
    for i in range(K):
        for j in range(K):
            for ow in range(OW2):
                for ci in range(C1):
                    W2[i, (ow + j) * C1 + ci, ow * C2:(ow + 1) * C2] = w2[:, ci, i, j]
    B2 = np.tile(b2, OW2)[None, :]                    # (1, 128)

    # 2x2 max-pool 0/1 selectors (exact, applied before elementwise max).
    def col_sel(qn, c):
        s = np.zeros((2, 2 * qn * c, qn * c), np.float32)
        for q in range(qn):
            for ch in range(c):
                s[0, (2 * q) * c + ch, q * c + ch] = 1.0
                s[1, (2 * q + 1) * c + ch, q * c + ch] = 1.0
        return s

    def row_sel(pn):
        s = np.zeros((2, pn, 2 * pn), np.float32)
        for p in range(pn):
            s[0, p, 2 * p] = 1.0
            s[1, p, 2 * p + 1] = 1.0
        return s

    SC1, SR1 = col_sel(PW1, C1), row_sel(PW1)         # (2,144,72), (2,12,24)
    SC2, SR2 = col_sel(PW2, C2), row_sel(PW2)         # (2,128,64), (2,4,8)

    # fc1 weight permuted from PyTorch NCHW-flatten order (c*16 + h*4 + w) to
    # the kernel's (h, w*16 + c) layout, split per h-row: (4, 64, 120).
    Wf1 = fw1.reshape(-1, C2, PW2, PW2).transpose(2, 3, 1, 0) \
             .reshape(PW2, PW2 * C2, fw1.shape[0])
    Wf2 = fw2.T                                       # (120, embed)

    ncls = cw.shape[0]
    Wc = np.zeros((cw.shape[1], 128), np.float32)     # pad classes -> 128 lanes
    Wc[:, :ncls] = cw.T
    Bc = np.zeros((1, 128), np.float32)
    Bc[0, :ncls] = cb

    bf16 = jnp.bfloat16
    return dict(
        w1=jnp.asarray(W1, bf16), b1=jnp.asarray(B1),
        w2=jnp.asarray(W2, bf16), b2=jnp.asarray(B2),
        sc1=jnp.asarray(SC1), sr1=jnp.asarray(SR1),
        sc2=jnp.asarray(SC2), sr2=jnp.asarray(SR2),
        wf1=jnp.asarray(Wf1, bf16), bf1=jnp.asarray(fb1[None, :]),
        wf2=jnp.asarray(Wf2, bf16), bf2=jnp.asarray(fb2[None, :]),
        wc=jnp.asarray(Wc, bf16), bc=jnp.asarray(Bc),
    )


_PACKED_ORDER = ("w1", "b1", "w2", "b2", "sc1", "sr1", "sc2", "sr2",
                 "wf1", "bf1", "wf2", "bf2", "wc", "bc")


# ---------------------------------- forward ----------------------------------

def lenet_forward(packed, x, num_classes=10):
    B, Cin, H, W = x.shape
    assert (Cin, H, W) == (1, 28, 28), "LeNet expects (B, 1, 28, 28) input"

    def full_spec(a):
        return pl.BlockSpec(a.shape, lambda b, _nd=a.ndim: (0,) * _nd)

    in_specs = [pl.BlockSpec((1, 1, H, W), lambda b: (b, 0, 0, 0))]
    in_specs += [full_spec(packed[k]) for k in _PACKED_ORDER]

    out = pl.pallas_call(
        _lenet_kernel,
        out_shape=jax.ShapeDtypeStruct((B, 1, 128), jnp.float32),
        grid=(B,),
        in_specs=in_specs,
        out_specs=pl.BlockSpec((1, 1, 128), lambda b: (b, 0, 0)),
        compiler_params=pltpu.CompilerParams(
            dimension_semantics=("parallel",)),
    )(x, *(packed[k] for k in _PACKED_ORDER))

    return out[:, 0, :num_classes]


# --------------------- parameters (deterministic synthetic) ------------------

def init_params(key, embedding_dim=84, num_classes=10):
    ks = jax.random.split(key, 10)

    def u(k, shape, fan_in):
        bound = 1.0 / jnp.sqrt(float(fan_in))
        return jax.random.uniform(k, shape, jnp.float32, -bound, bound)

    p = {}
    p["conv1_w"] = u(ks[0], (6, 1, 5, 5), 1 * 5 * 5)
    p["conv1_b"] = u(ks[1], (6,), 1 * 5 * 5)
    p["conv2_w"] = u(ks[2], (16, 6, 5, 5), 6 * 5 * 5)
    p["conv2_b"] = u(ks[3], (16,), 6 * 5 * 5)
    p["fc1_w"] = u(ks[4], (120, 16 * 4 * 4), 16 * 4 * 4)    # PyTorch (out, in)
    p["fc1_b"] = u(ks[5], (120,), 16 * 4 * 4)
    p["fc2_w"] = u(ks[6], (embedding_dim, 120), 120)
    p["fc2_b"] = u(ks[7], (embedding_dim,), 120)
    p["cls_w"] = u(ks[8], (num_classes, embedding_dim), embedding_dim)
    p["cls_b"] = u(ks[9], (num_classes,), embedding_dim)
    return p


if __name__ == "__main__":
    key = jax.random.PRNGKey(0)
    k_x, k_p = jax.random.split(key)
    params = init_params(k_p, embedding_dim=84, num_classes=10)
    packed = pack_params(params)                       # one-time pre-pack
    x = jax.random.normal(k_x, (2, 1, 28, 28), dtype=jnp.float32)

    fwd = jax.jit(lenet_forward)
    out = fwd(packed, x)
    jax.block_until_ready(out)
    assert out.shape == (2, 10) and out.dtype == jnp.float32
    print("KERNEL_OK")
</pallas_src>

<mosaic_0001>
module attributes {stable_mosaic.version = 11 : i64} {
  func.func @_lenet_kernel(%arg0: i32, %arg1: memref<1x1x28x28xf32, #tpu.memory_space<vmem>>, %arg2: memref<5x28x144xbf16, #tpu.memory_space<vmem>>, %arg3: memref<1x144xf32, #tpu.memory_space<vmem>>, %arg4: memref<5x72x128xbf16, #tpu.memory_space<vmem>>, %arg5: memref<1x128xf32, #tpu.memory_space<vmem>>, %arg6: memref<2x144x72xf32, #tpu.memory_space<vmem>>, %arg7: memref<2x12x24xf32, #tpu.memory_space<vmem>>, %arg8: memref<2x128x64xf32, #tpu.memory_space<vmem>>, %arg9: memref<2x4x8xf32, #tpu.memory_space<vmem>>, %arg10: memref<4x64x120xbf16, #tpu.memory_space<vmem>>, %arg11: memref<1x120xf32, #tpu.memory_space<vmem>>, %arg12: memref<120x84xbf16, #tpu.memory_space<vmem>>, %arg13: memref<1x84xf32, #tpu.memory_space<vmem>>, %arg14: memref<84x128xbf16, #tpu.memory_space<vmem>>, %arg15: memref<1x128xf32, #tpu.memory_space<vmem>>, %arg16: memref<1x1x128xf32, #tpu.memory_space<vmem>>) attributes {dimension_semantics = [#tpu.dimension_semantics<parallel>], iteration_bounds = array<i64: 2>, scalar_prefetch = 0 : i64, scratch_operands = 0 : i64, tpu.core_type = #tpu.core_type<tc>, window_params = [{transform_indices = @transform_0, window_bounds = array<i64: 1, 1, 28, 28>}, {pipeline_mode = #tpu.pipeline_mode<synchronous>, transform_indices = @transform_1, window_bounds = array<i64: 5, 28, 144>}, {pipeline_mode = #tpu.pipeline_mode<synchronous>, transform_indices = @transform_2, window_bounds = array<i64: 1, 144>}, {pipeline_mode = #tpu.pipeline_mode<synchronous>, transform_indices = @transform_3, window_bounds = array<i64: 5, 72, 128>}, {pipeline_mode = #tpu.pipeline_mode<synchronous>, transform_indices = @transform_4, window_bounds = array<i64: 1, 128>}, {pipeline_mode = #tpu.pipeline_mode<synchronous>, transform_indices = @transform_5, window_bounds = array<i64: 2, 144, 72>}, {pipeline_mode = #tpu.pipeline_mode<synchronous>, transform_indices = @transform_6, window_bounds = array<i64: 2, 12, 24>}, {pipeline_mode = #tpu.pipeline_mode<synchronous>, transform_indices = @transform_7, window_bounds = array<i64: 2, 128, 64>}, {pipeline_mode = #tpu.pipeline_mode<synchronous>, transform_indices = @transform_8, window_bounds = array<i64: 2, 4, 8>}, {pipeline_mode = #tpu.pipeline_mode<synchronous>, transform_indices = @transform_9, window_bounds = array<i64: 4, 64, 120>}, {pipeline_mode = #tpu.pipeline_mode<synchronous>, transform_indices = @transform_10, window_bounds = array<i64: 1, 120>}, {pipeline_mode = #tpu.pipeline_mode<synchronous>, transform_indices = @transform_11, window_bounds = array<i64: 120, 84>}, {pipeline_mode = #tpu.pipeline_mode<synchronous>, transform_indices = @transform_12, window_bounds = array<i64: 1, 84>}, {pipeline_mode = #tpu.pipeline_mode<synchronous>, transform_indices = @transform_13, window_bounds = array<i64: 84, 128>}, {pipeline_mode = #tpu.pipeline_mode<synchronous>, transform_indices = @transform_14, window_bounds = array<i64: 1, 128>}, {transform_indices = @transform_15, window_bounds = array<i64: 1, 1, 128>}]} {
    %c0 = arith.constant 0 : index
    %c0_0 = arith.constant 0 : index
    %c0_1 = arith.constant 0 : index
    %c0_2 = arith.constant 0 : index
    %0 = vector.load %arg1[%c0, %c0_0, %c0_1, %c0_2] : memref<1x1x28x28xf32, #tpu.memory_space<vmem>>, vector<1x1x28x28xf32>
    %1 = vector.shape_cast %0 : vector<1x1x28x28xf32> to vector<28x28xf32>
    %2 = vector.extract_strided_slice %1 {offsets = [0, 0], sizes = [24, 28], strides = [1, 1]} : vector<28x28xf32> to vector<24x28xf32>
    %3 = arith.truncf %2 : vector<24x28xf32> to vector<24x28xbf16>
    %c0_3 = arith.constant 0 : index
    %c0_4 = arith.constant 0 : index
    %c0_5 = arith.constant 0 : index
    %4 = vector.load %arg2[%c0_3, %c0_4, %c0_5] : memref<5x28x144xbf16, #tpu.memory_space<vmem>>, vector<1x28x144xbf16>
    %5 = vector.shape_cast %4 : vector<1x28x144xbf16> to vector<28x144xbf16>
    %cst = arith.constant dense<0.000000e+00> : vector<24x144xf32>
    %6 = tpu.matmul %3, %5, %cst {dimension_numbers = #tpu.dot_dimension_numbers<[1], [0], [0], [1], [0, 0, 1, 1], [], []>} : vector<24x28xbf16>, vector<28x144xbf16>, vector<24x144xf32> -> vector<24x144xf32>
    %7 = vector.extract_strided_slice %1 {offsets = [1, 0], sizes = [24, 28], strides = [1, 1]} : vector<28x28xf32> to vector<24x28xf32>
    %8 = arith.truncf %7 : vector<24x28xf32> to vector<24x28xbf16>
    %c1 = arith.constant 1 : index
    %c0_6 = arith.constant 0 : index
    %c0_7 = arith.constant 0 : index
    %9 = vector.load %arg2[%c1, %c0_6, %c0_7] : memref<5x28x144xbf16, #tpu.memory_space<vmem>>, vector<1x28x144xbf16>
    %10 = vector.shape_cast %9 : vector<1x28x144xbf16> to vector<28x144xbf16>
    %cst_8 = arith.constant dense<0.000000e+00> : vector<24x144xf32>
    %11 = tpu.matmul %8, %10, %cst_8 {dimension_numbers = #tpu.dot_dimension_numbers<[1], [0], [0], [1], [0, 0, 1, 1], [], []>} : vector<24x28xbf16>, vector<28x144xbf16>, vector<24x144xf32> -> vector<24x144xf32>
    %12 = arith.addf %6, %11 : vector<24x144xf32>
    %13 = vector.extract_strided_slice %1 {offsets = [2, 0], sizes = [24, 28], strides = [1, 1]} : vector<28x28xf32> to vector<24x28xf32>
    %14 = arith.truncf %13 : vector<24x28xf32> to vector<24x28xbf16>
    %c2 = arith.constant 2 : index
    %c0_9 = arith.constant 0 : index
    %c0_10 = arith.constant 0 : index
    %15 = vector.load %arg2[%c2, %c0_9, %c0_10] : memref<5x28x144xbf16, #tpu.memory_space<vmem>>, vector<1x28x144xbf16>
    %16 = vector.shape_cast %15 : vector<1x28x144xbf16> to vector<28x144xbf16>
    %cst_11 = arith.constant dense<0.000000e+00> : vector<24x144xf32>
    %17 = tpu.matmul %14, %16, %cst_11 {dimension_numbers = #tpu.dot_dimension_numbers<[1], [0], [0], [1], [0, 0, 1, 1], [], []>} : vector<24x28xbf16>, vector<28x144xbf16>, vector<24x144xf32> -> vector<24x144xf32>
    %18 = arith.addf %12, %17 : vector<24x144xf32>
    %19 = vector.extract_strided_slice %1 {offsets = [3, 0], sizes = [24, 28], strides = [1, 1]} : vector<28x28xf32> to vector<24x28xf32>
    %20 = arith.truncf %19 : vector<24x28xf32> to vector<24x28xbf16>
    %c3 = arith.constant 3 : index
    %c0_12 = arith.constant 0 : index
    %c0_13 = arith.constant 0 : index
    %21 = vector.load %arg2[%c3, %c0_12, %c0_13] : memref<5x28x144xbf16, #tpu.memory_space<vmem>>, vector<1x28x144xbf16>
    %22 = vector.shape_cast %21 : vector<1x28x144xbf16> to vector<28x144xbf16>
    %cst_14 = arith.constant dense<0.000000e+00> : vector<24x144xf32>
    %23 = tpu.matmul %20, %22, %cst_14 {dimension_numbers = #tpu.dot_dimension_numbers<[1], [0], [0], [1], [0, 0, 1, 1], [], []>} : vector<24x28xbf16>, vector<28x144xbf16>, vector<24x144xf32> -> vector<24x144xf32>
    %24 = arith.addf %18, %23 : vector<24x144xf32>
    %25 = vector.extract_strided_slice %1 {offsets = [4, 0], sizes = [24, 28], strides = [1, 1]} : vector<28x28xf32> to vector<24x28xf32>
    %26 = arith.truncf %25 : vector<24x28xf32> to vector<24x28xbf16>
    %c4 = arith.constant 4 : index
    %c0_15 = arith.constant 0 : index
    %c0_16 = arith.constant 0 : index
    %27 = vector.load %arg2[%c4, %c0_15, %c0_16] : memref<5x28x144xbf16, #tpu.memory_space<vmem>>, vector<1x28x144xbf16>
    %28 = vector.shape_cast %27 : vector<1x28x144xbf16> to vector<28x144xbf16>
    %cst_17 = arith.constant dense<0.000000e+00> : vector<24x144xf32>
    %29 = tpu.matmul %26, %28, %cst_17 {dimension_numbers = #tpu.dot_dimension_numbers<[1], [0], [0], [1], [0, 0, 1, 1], [], []>} : vector<24x28xbf16>, vector<28x144xbf16>, vector<24x144xf32> -> vector<24x144xf32>
    %30 = arith.addf %24, %29 : vector<24x144xf32>
    %c0_18 = arith.constant 0 : index
    %c0_19 = arith.constant 0 : index
    %31 = vector.load %arg3[%c0_18, %c0_19] : memref<1x144xf32, #tpu.memory_space<vmem>>, vector<1x144xf32>
    %32 = vector.broadcast %31 : vector<1x144xf32> to vector<24x144xf32>
    %33 = arith.addf %30, %32 : vector<24x144xf32>
    %cst_20 = arith.constant 0.000000e+00 : f32
    %34 = vector.broadcast %cst_20 : f32 to vector<24x144xf32>
    %35 = arith.maximumf %33, %34 : vector<24x144xf32>
    %c0_21 = arith.constant 0 : index
    %c0_22 = arith.constant 0 : index
    %c0_23 = arith.constant 0 : index
    %36 = vector.load %arg6[%c0_21, %c0_22, %c0_23] : memref<2x144x72xf32, #tpu.memory_space<vmem>>, vector<1x144x72xf32>
    %37 = vector.shape_cast %36 : vector<1x144x72xf32> to vector<144x72xf32>
    %cst_24 = arith.constant dense<0.000000e+00> : vector<24x72xf32>
    %38 = tpu.matmul %35, %37, %cst_24 {dimension_numbers = #tpu.dot_dimension_numbers<[1], [0], [0], [1], [0, 0, 1, 1], [], []>} : vector<24x144xf32>, vector<144x72xf32>, vector<24x72xf32> -> vector<24x72xf32>
    %c1_25 = arith.constant 1 : index
    %c0_26 = arith.constant 0 : index
    %c0_27 = arith.constant 0 : index
    %39 = vector.load %arg6[%c1_25, %c0_26, %c0_27] : memref<2x144x72xf32, #tpu.memory_space<vmem>>, vector<1x144x72xf32>
    %40 = vector.shape_cast %39 : vector<1x144x72xf32> to vector<144x72xf32>
    %cst_28 = arith.constant dense<0.000000e+00> : vector<24x72xf32>
    %41 = tpu.matmul %35, %40, %cst_28 {dimension_numbers = #tpu.dot_dimension_numbers<[1], [0], [0], [1], [0, 0, 1, 1], [], []>} : vector<24x144xf32>, vector<144x72xf32>, vector<24x72xf32> -> vector<24x72xf32>
    %42 = arith.maximumf %38, %41 : vector<24x72xf32>
    %c0_29 = arith.constant 0 : index
    %c0_30 = arith.constant 0 : index
    %c0_31 = arith.constant 0 : index
    %43 = vector.load %arg7[%c0_29, %c0_30, %c0_31] : memref<2x12x24xf32, #tpu.memory_space<vmem>>, vector<1x12x24xf32>
    %44 = vector.shape_cast %43 : vector<1x12x24xf32> to vector<12x24xf32>
    %cst_32 = arith.constant dense<0.000000e+00> : vector<12x72xf32>
    %45 = tpu.matmul %44, %42, %cst_32 {dimension_numbers = #tpu.dot_dimension_numbers<[1], [0], [0], [1], [0, 0, 1, 1], [], []>} : vector<12x24xf32>, vector<24x72xf32>, vector<12x72xf32> -> vector<12x72xf32>
    %c1_33 = arith.constant 1 : index
    %c0_34 = arith.constant 0 : index
    %c0_35 = arith.constant 0 : index
    %46 = vector.load %arg7[%c1_33, %c0_34, %c0_35] : memref<2x12x24xf32, #tpu.memory_space<vmem>>, vector<1x12x24xf32>
    %47 = vector.shape_cast %46 : vector<1x12x24xf32> to vector<12x24xf32>
    %cst_36 = arith.constant dense<0.000000e+00> : vector<12x72xf32>
    %48 = tpu.matmul %47, %42, %cst_36 {dimension_numbers = #tpu.dot_dimension_numbers<[1], [0], [0], [1], [0, 0, 1, 1], [], []>} : vector<12x24xf32>, vector<24x72xf32>, vector<12x72xf32> -> vector<12x72xf32>
    %49 = arith.maximumf %45, %48 : vector<12x72xf32>
    %50 = vector.extract_strided_slice %49 {offsets = [0, 0], sizes = [8, 72], strides = [1, 1]} : vector<12x72xf32> to vector<8x72xf32>
    %51 = arith.truncf %50 : vector<8x72xf32> to vector<8x72xbf16>
    %c0_37 = arith.constant 0 : index
    %c0_38 = arith.constant 0 : index
    %c0_39 = arith.constant 0 : index
    %52 = vector.load %arg4[%c0_37, %c0_38, %c0_39] : memref<5x72x128xbf16, #tpu.memory_space<vmem>>, vector<1x72x128xbf16>
    %53 = vector.shape_cast %52 : vector<1x72x128xbf16> to vector<72x128xbf16>
    %cst_40 = arith.constant dense<0.000000e+00> : vector<8x128xf32>
    %54 = tpu.matmul %51, %53, %cst_40 {dimension_numbers = #tpu.dot_dimension_numbers<[1], [0], [0], [1], [0, 0, 1, 1], [], []>} : vector<8x72xbf16>, vector<72x128xbf16>, vector<8x128xf32> -> vector<8x128xf32>
    %55 = vector.extract_strided_slice %49 {offsets = [1, 0], sizes = [8, 72], strides = [1, 1]} : vector<12x72xf32> to vector<8x72xf32>
    %56 = arith.truncf %55 : vector<8x72xf32> to vector<8x72xbf16>
    %c1_41 = arith.constant 1 : index
    %c0_42 = arith.constant 0 : index
    %c0_43 = arith.constant 0 : index
    %57 = vector.load %arg4[%c1_41, %c0_42, %c0_43] : memref<5x72x128xbf16, #tpu.memory_space<vmem>>, vector<1x72x128xbf16>
    %58 = vector.shape_cast %57 : vector<1x72x128xbf16> to vector<72x128xbf16>
    %cst_44 = arith.constant dense<0.000000e+00> : vector<8x128xf32>
    %59 = tpu.matmul %56, %58, %cst_44 {dimension_numbers = #tpu.dot_dimension_numbers<[1], [0], [0], [1], [0, 0, 1, 1], [], []>} : vector<8x72xbf16>, vector<72x128xbf16>, vector<8x128xf32> -> vector<8x128xf32>
    %60 = arith.addf %54, %59 : vector<8x128xf32>
    %61 = vector.extract_strided_slice %49 {offsets = [2, 0], sizes = [8, 72], strides = [1, 1]} : vector<12x72xf32> to vector<8x72xf32>
    %62 = arith.truncf %61 : vector<8x72xf32> to vector<8x72xbf16>
    %c2_45 = arith.constant 2 : index
    %c0_46 = arith.constant 0 : index
    %c0_47 = arith.constant 0 : index
    %63 = vector.load %arg4[%c2_45, %c0_46, %c0_47] : memref<5x72x128xbf16, #tpu.memory_space<vmem>>, vector<1x72x128xbf16>
    %64 = vector.shape_cast %63 : vector<1x72x128xbf16> to vector<72x128xbf16>
    %cst_48 = arith.constant dense<0.000000e+00> : vector<8x128xf32>
    %65 = tpu.matmul %62, %64, %cst_48 {dimension_numbers = #tpu.dot_dimension_numbers<[1], [0], [0], [1], [0, 0, 1, 1], [], []>} : vector<8x72xbf16>, vector<72x128xbf16>, vector<8x128xf32> -> vector<8x128xf32>
    %66 = arith.addf %60, %65 : vector<8x128xf32>
    %67 = vector.extract_strided_slice %49 {offsets = [3, 0], sizes = [8, 72], strides = [1, 1]} : vector<12x72xf32> to vector<8x72xf32>
    %68 = arith.truncf %67 : vector<8x72xf32> to vector<8x72xbf16>
    %c3_49 = arith.constant 3 : index
    %c0_50 = arith.constant 0 : index
    %c0_51 = arith.constant 0 : index
    %69 = vector.load %arg4[%c3_49, %c0_50, %c0_51] : memref<5x72x128xbf16, #tpu.memory_space<vmem>>, vector<1x72x128xbf16>
    %70 = vector.shape_cast %69 : vector<1x72x128xbf16> to vector<72x128xbf16>
    %cst_52 = arith.constant dense<0.000000e+00> : vector<8x128xf32>
    %71 = tpu.matmul %68, %70, %cst_52 {dimension_numbers = #tpu.dot_dimension_numbers<[1], [0], [0], [1], [0, 0, 1, 1], [], []>} : vector<8x72xbf16>, vector<72x128xbf16>, vector<8x128xf32> -> vector<8x128xf32>
    %72 = arith.addf %66, %71 : vector<8x128xf32>
    %73 = vector.extract_strided_slice %49 {offsets = [4, 0], sizes = [8, 72], strides = [1, 1]} : vector<12x72xf32> to vector<8x72xf32>
    %74 = arith.truncf %73 : vector<8x72xf32> to vector<8x72xbf16>
    %c4_53 = arith.constant 4 : index
    %c0_54 = arith.constant 0 : index
    %c0_55 = arith.constant 0 : index
    %75 = vector.load %arg4[%c4_53, %c0_54, %c0_55] : memref<5x72x128xbf16, #tpu.memory_space<vmem>>, vector<1x72x128xbf16>
    %76 = vector.shape_cast %75 : vector<1x72x128xbf16> to vector<72x128xbf16>
    %cst_56 = arith.constant dense<0.000000e+00> : vector<8x128xf32>
    %77 = tpu.matmul %74, %76, %cst_56 {dimension_numbers = #tpu.dot_dimension_numbers<[1], [0], [0], [1], [0, 0, 1, 1], [], []>} : vector<8x72xbf16>, vector<72x128xbf16>, vector<8x128xf32> -> vector<8x128xf32>
    %78 = arith.addf %72, %77 : vector<8x128xf32>
    %c0_57 = arith.constant 0 : index
    %c0_58 = arith.constant 0 : index
    %79 = vector.load %arg5[%c0_57, %c0_58] : memref<1x128xf32, #tpu.memory_space<vmem>>, vector<1x128xf32>
    %80 = vector.broadcast %79 : vector<1x128xf32> to vector<8x128xf32>
    %81 = arith.addf %78, %80 : vector<8x128xf32>
    %cst_59 = arith.constant 0.000000e+00 : f32
    %82 = vector.broadcast %cst_59 : f32 to vector<8x128xf32>
    %83 = arith.maximumf %81, %82 : vector<8x128xf32>
    %c0_60 = arith.constant 0 : index
    %c0_61 = arith.constant 0 : index
    %c0_62 = arith.constant 0 : index
    %84 = vector.load %arg8[%c0_60, %c0_61, %c0_62] : memref<2x128x64xf32, #tpu.memory_space<vmem>>, vector<1x128x64xf32>
    %85 = vector.shape_cast %84 : vector<1x128x64xf32> to vector<128x64xf32>
    %cst_63 = arith.constant dense<0.000000e+00> : vector<8x64xf32>
    %86 = tpu.matmul %83, %85, %cst_63 {dimension_numbers = #tpu.dot_dimension_numbers<[1], [0], [0], [1], [0, 0, 1, 1], [], []>} : vector<8x128xf32>, vector<128x64xf32>, vector<8x64xf32> -> vector<8x64xf32>
    %c1_64 = arith.constant 1 : index
    %c0_65 = arith.constant 0 : index
    %c0_66 = arith.constant 0 : index
    %87 = vector.load %arg8[%c1_64, %c0_65, %c0_66] : memref<2x128x64xf32, #tpu.memory_space<vmem>>, vector<1x128x64xf32>
    %88 = vector.shape_cast %87 : vector<1x128x64xf32> to vector<128x64xf32>
    %cst_67 = arith.constant dense<0.000000e+00> : vector<8x64xf32>
    %89 = tpu.matmul %83, %88, %cst_67 {dimension_numbers = #tpu.dot_dimension_numbers<[1], [0], [0], [1], [0, 0, 1, 1], [], []>} : vector<8x128xf32>, vector<128x64xf32>, vector<8x64xf32> -> vector<8x64xf32>
    %90 = arith.maximumf %86, %89 : vector<8x64xf32>
    %c0_68 = arith.constant 0 : index
    %c0_69 = arith.constant 0 : index
    %c0_70 = arith.constant 0 : index
    %91 = vector.load %arg9[%c0_68, %c0_69, %c0_70] : memref<2x4x8xf32, #tpu.memory_space<vmem>>, vector<1x4x8xf32>
    %92 = vector.shape_cast %91 : vector<1x4x8xf32> to vector<4x8xf32>
    %cst_71 = arith.constant dense<0.000000e+00> : vector<4x64xf32>
    %93 = tpu.matmul %92, %90, %cst_71 {dimension_numbers = #tpu.dot_dimension_numbers<[1], [0], [0], [1], [0, 0, 1, 1], [], []>} : vector<4x8xf32>, vector<8x64xf32>, vector<4x64xf32> -> vector<4x64xf32>
    %c1_72 = arith.constant 1 : index
    %c0_73 = arith.constant 0 : index
    %c0_74 = arith.constant 0 : index
    %94 = vector.load %arg9[%c1_72, %c0_73, %c0_74] : memref<2x4x8xf32, #tpu.memory_space<vmem>>, vector<1x4x8xf32>
    %95 = vector.shape_cast %94 : vector<1x4x8xf32> to vector<4x8xf32>
    %cst_75 = arith.constant dense<0.000000e+00> : vector<4x64xf32>
    %96 = tpu.matmul %95, %90, %cst_75 {dimension_numbers = #tpu.dot_dimension_numbers<[1], [0], [0], [1], [0, 0, 1, 1], [], []>} : vector<4x8xf32>, vector<8x64xf32>, vector<4x64xf32> -> vector<4x64xf32>
    %97 = arith.maximumf %93, %96 : vector<4x64xf32>
    %98 = vector.extract_strided_slice %97 {offsets = [0, 0], sizes = [1, 64], strides = [1, 1]} : vector<4x64xf32> to vector<1x64xf32>
    %99 = arith.truncf %98 : vector<1x64xf32> to vector<1x64xbf16>
    %c0_76 = arith.constant 0 : index
    %c0_77 = arith.constant 0 : index
    %c0_78 = arith.constant 0 : index
    %100 = vector.load %arg10[%c0_76, %c0_77, %c0_78] : memref<4x64x120xbf16, #tpu.memory_space<vmem>>, vector<1x64x120xbf16>
    %101 = vector.shape_cast %100 : vector<1x64x120xbf16> to vector<64x120xbf16>
    %cst_79 = arith.constant dense<0.000000e+00> : vector<1x120xf32>
    %102 = tpu.matmul %99, %101, %cst_79 {dimension_numbers = #tpu.dot_dimension_numbers<[1], [0], [0], [1], [0, 0, 1, 1], [], []>} : vector<1x64xbf16>, vector<64x120xbf16>, vector<1x120xf32> -> vector<1x120xf32>
    %103 = vector.extract_strided_slice %97 {offsets = [1, 0], sizes = [1, 64], strides = [1, 1]} : vector<4x64xf32> to vector<1x64xf32>
    %104 = arith.truncf %103 : vector<1x64xf32> to vector<1x64xbf16>
    %c1_80 = arith.constant 1 : index
    %c0_81 = arith.constant 0 : index
    %c0_82 = arith.constant 0 : index
    %105 = vector.load %arg10[%c1_80, %c0_81, %c0_82] : memref<4x64x120xbf16, #tpu.memory_space<vmem>>, vector<1x64x120xbf16>
    %106 = vector.shape_cast %105 : vector<1x64x120xbf16> to vector<64x120xbf16>
    %cst_83 = arith.constant dense<0.000000e+00> : vector<1x120xf32>
    %107 = tpu.matmul %104, %106, %cst_83 {dimension_numbers = #tpu.dot_dimension_numbers<[1], [0], [0], [1], [0, 0, 1, 1], [], []>} : vector<1x64xbf16>, vector<64x120xbf16>, vector<1x120xf32> -> vector<1x120xf32>
    %108 = arith.addf %102, %107 : vector<1x120xf32>
    %109 = vector.extract_strided_slice %97 {offsets = [2, 0], sizes = [1, 64], strides = [1, 1]} : vector<4x64xf32> to vector<1x64xf32>
    %110 = arith.truncf %109 : vector<1x64xf32> to vector<1x64xbf16>
    %c2_84 = arith.constant 2 : index
    %c0_85 = arith.constant 0 : index
    %c0_86 = arith.constant 0 : index
    %111 = vector.load %arg10[%c2_84, %c0_85, %c0_86] : memref<4x64x120xbf16, #tpu.memory_space<vmem>>, vector<1x64x120xbf16>
    %112 = vector.shape_cast %111 : vector<1x64x120xbf16> to vector<64x120xbf16>
    %cst_87 = arith.constant dense<0.000000e+00> : vector<1x120xf32>
    %113 = tpu.matmul %110, %112, %cst_87 {dimension_numbers = #tpu.dot_dimension_numbers<[1], [0], [0], [1], [0, 0, 1, 1], [], []>} : vector<1x64xbf16>, vector<64x120xbf16>, vector<1x120xf32> -> vector<1x120xf32>
    %114 = arith.addf %108, %113 : vector<1x120xf32>
    %115 = vector.extract_strided_slice %97 {offsets = [3, 0], sizes = [1, 64], strides = [1, 1]} : vector<4x64xf32> to vector<1x64xf32>
    %116 = arith.truncf %115 : vector<1x64xf32> to vector<1x64xbf16>
    %c3_88 = arith.constant 3 : index
    %c0_89 = arith.constant 0 : index
    %c0_90 = arith.constant 0 : index
    %117 = vector.load %arg10[%c3_88, %c0_89, %c0_90] : memref<4x64x120xbf16, #tpu.memory_space<vmem>>, vector<1x64x120xbf16>
    %118 = vector.shape_cast %117 : vector<1x64x120xbf16> to vector<64x120xbf16>
    %cst_91 = arith.constant dense<0.000000e+00> : vector<1x120xf32>
    %119 = tpu.matmul %116, %118, %cst_91 {dimension_numbers = #tpu.dot_dimension_numbers<[1], [0], [0], [1], [0, 0, 1, 1], [], []>} : vector<1x64xbf16>, vector<64x120xbf16>, vector<1x120xf32> -> vector<1x120xf32>
    %120 = arith.addf %114, %119 : vector<1x120xf32>
    %c0_92 = arith.constant 0 : index
    %c0_93 = arith.constant 0 : index
    %121 = vector.load %arg11[%c0_92, %c0_93] : memref<1x120xf32, #tpu.memory_space<vmem>>, vector<1x120xf32>
    %122 = arith.addf %120, %121 : vector<1x120xf32>
    %cst_94 = arith.constant 0.000000e+00 : f32
    %123 = vector.broadcast %cst_94 : f32 to vector<1x120xf32>
    %124 = arith.maximumf %122, %123 : vector<1x120xf32>
    %125 = arith.truncf %124 : vector<1x120xf32> to vector<1x120xbf16>
    %c0_95 = arith.constant 0 : index
    %c0_96 = arith.constant 0 : index
    %126 = vector.load %arg12[%c0_95, %c0_96] : memref<120x84xbf16, #tpu.memory_space<vmem>>, vector<120x84xbf16>
    %cst_97 = arith.constant dense<0.000000e+00> : vector<1x84xf32>
    %127 = tpu.matmul %125, %126, %cst_97 {dimension_numbers = #tpu.dot_dimension_numbers<[1], [0], [0], [1], [0, 0, 1, 1], [], []>} : vector<1x120xbf16>, vector<120x84xbf16>, vector<1x84xf32> -> vector<1x84xf32>
    %c0_98 = arith.constant 0 : index
    %c0_99 = arith.constant 0 : index
    %128 = vector.load %arg13[%c0_98, %c0_99] : memref<1x84xf32, #tpu.memory_space<vmem>>, vector<1x84xf32>
    %129 = arith.addf %127, %128 : vector<1x84xf32>
    %cst_100 = arith.constant 0.000000e+00 : f32
    %130 = vector.broadcast %cst_100 : f32 to vector<1x84xf32>
    %131 = arith.maximumf %129, %130 : vector<1x84xf32>
    %132 = arith.truncf %131 : vector<1x84xf32> to vector<1x84xbf16>
    %c0_101 = arith.constant 0 : index
    %c0_102 = arith.constant 0 : index
    %133 = vector.load %arg14[%c0_101, %c0_102] : memref<84x128xbf16, #tpu.memory_space<vmem>>, vector<84x128xbf16>
    %cst_103 = arith.constant dense<0.000000e+00> : vector<1x128xf32>
    %134 = tpu.matmul %132, %133, %cst_103 {dimension_numbers = #tpu.dot_dimension_numbers<[1], [0], [0], [1], [0, 0, 1, 1], [], []>} : vector<1x84xbf16>, vector<84x128xbf16>, vector<1x128xf32> -> vector<1x128xf32>
    %c0_104 = arith.constant 0 : index
    %c0_105 = arith.constant 0 : index
    %135 = vector.load %arg15[%c0_104, %c0_105] : memref<1x128xf32, #tpu.memory_space<vmem>>, vector<1x128xf32>
    %136 = arith.addf %134, %135 : vector<1x128xf32>
    %c0_106 = arith.constant 0 : index
    %c0_107 = arith.constant 0 : index
    %c0_108 = arith.constant 0 : index
    %137 = vector.load %arg16[%c0_106, %c0_107, %c0_108] : memref<1x1x128xf32, #tpu.memory_space<vmem>>, vector<1x1x128xf32>
    %138 = vector.shape_cast %137 : vector<1x1x128xf32> to vector<1x128xf32>
    %139 = vector.shape_cast %136 : vector<1x128xf32> to vector<1x1x128xf32>
    tpu.vector_store %arg16[%c0_106, %c0_107, %c0_108], %139 {strides = array<i32>} : memref<1x1x128xf32, #tpu.memory_space<vmem>>, vector<1x1x128xf32>,
    return
  }
  func.func @transform_0(%arg0: i32) -> (i32, i32, i32, i32) {
    %c0_i32 = arith.constant 0 : i32
    %c0_i32_0 = arith.constant 0 : i32
    %c0_i32_1 = arith.constant 0 : i32
    %c0_i32_2 = arith.constant 0 : i32
    return %arg0, %c0_i32, %c0_i32_0, %c0_i32_1 : i32, i32, i32, i32
  }
  func.func @transform_1(%arg0: i32) -> (i32, i32, i32) {
    %c0_i32 = arith.constant 0 : i32
    %c0_i32_0 = arith.constant 0 : i32
    %c0_i32_1 = arith.constant 0 : i32
    %c0_i32_2 = arith.constant 0 : i32
    return %c0_i32, %c0_i32_0, %c0_i32_1 : i32, i32, i32
  }
  func.func @transform_2(%arg0: i32) -> (i32, i32) {
    %c0_i32 = arith.constant 0 : i32
    %c0_i32_0 = arith.constant 0 : i32
    %c0_i32_1 = arith.constant 0 : i32
    return %c0_i32, %c0_i32_0 : i32, i32
  }
  func.func @transform_3(%arg0: i32) -> (i32, i32, i32) {
    %c0_i32 = arith.constant 0 : i32
    %c0_i32_0 = arith.constant 0 : i32
    %c0_i32_1 = arith.constant 0 : i32
    %c0_i32_2 = arith.constant 0 : i32
    return %c0_i32, %c0_i32_0, %c0_i32_1 : i32, i32, i32
  }
  func.func @transform_4(%arg0: i32) -> (i32, i32) {
    %c0_i32 = arith.constant 0 : i32
    %c0_i32_0 = arith.constant 0 : i32
    %c0_i32_1 = arith.constant 0 : i32
    return %c0_i32, %c0_i32_0 : i32, i32
  }
  func.func @transform_5(%arg0: i32) -> (i32, i32, i32) {
    %c0_i32 = arith.constant 0 : i32
    %c0_i32_0 = arith.constant 0 : i32
    %c0_i32_1 = arith.constant 0 : i32
    %c0_i32_2 = arith.constant 0 : i32
    return %c0_i32, %c0_i32_0, %c0_i32_1 : i32, i32, i32
  }
  func.func @transform_6(%arg0: i32) -> (i32, i32, i32) {
    %c0_i32 = arith.constant 0 : i32
    %c0_i32_0 = arith.constant 0 : i32
    %c0_i32_1 = arith.constant 0 : i32
    %c0_i32_2 = arith.constant 0 : i32
    return %c0_i32, %c0_i32_0, %c0_i32_1 : i32, i32, i32
  }
  func.func @transform_7(%arg0: i32) -> (i32, i32, i32) {
    %c0_i32 = arith.constant 0 : i32
    %c0_i32_0 = arith.constant 0 : i32
    %c0_i32_1 = arith.constant 0 : i32
    %c0_i32_2 = arith.constant 0 : i32
    return %c0_i32, %c0_i32_0, %c0_i32_1 : i32, i32, i32
  }
  func.func @transform_8(%arg0: i32) -> (i32, i32, i32) {
    %c0_i32 = arith.constant 0 : i32
    %c0_i32_0 = arith.constant 0 : i32
    %c0_i32_1 = arith.constant 0 : i32
    %c0_i32_2 = arith.constant 0 : i32
    return %c0_i32, %c0_i32_0, %c0_i32_1 : i32, i32, i32
  }
  func.func @transform_9(%arg0: i32) -> (i32, i32, i32) {
    %c0_i32 = arith.constant 0 : i32
    %c0_i32_0 = arith.constant 0 : i32
    %c0_i32_1 = arith.constant 0 : i32
    %c0_i32_2 = arith.constant 0 : i32
    return %c0_i32, %c0_i32_0, %c0_i32_1 : i32, i32, i32
  }
  func.func @transform_10(%arg0: i32) -> (i32, i32) {
    %c0_i32 = arith.constant 0 : i32
    %c0_i32_0 = arith.constant 0 : i32
    %c0_i32_1 = arith.constant 0 : i32
    return %c0_i32, %c0_i32_0 : i32, i32
  }
  func.func @transform_11(%arg0: i32) -> (i32, i32) {
    %c0_i32 = arith.constant 0 : i32
    %c0_i32_0 = arith.constant 0 : i32
    %c0_i32_1 = arith.constant 0 : i32
    return %c0_i32, %c0_i32_0 : i32, i32
  }
  func.func @transform_12(%arg0: i32) -> (i32, i32) {
    %c0_i32 = arith.constant 0 : i32
    %c0_i32_0 = arith.constant 0 : i32
    %c0_i32_1 = arith.constant 0 : i32
    return %c0_i32, %c0_i32_0 : i32, i32
  }
  func.func @transform_13(%arg0: i32) -> (i32, i32) {
    %c0_i32 = arith.constant 0 : i32
    %c0_i32_0 = arith.constant 0 : i32
    %c0_i32_1 = arith.constant 0 : i32
    return %c0_i32, %c0_i32_0 : i32, i32
  }
  func.func @transform_14(%arg0: i32) -> (i32, i32) {
    %c0_i32 = arith.constant 0 : i32
    %c0_i32_0 = arith.constant 0 : i32
    %c0_i32_1 = arith.constant 0 : i32
    return %c0_i32, %c0_i32_0 : i32, i32
  }
  func.func @transform_15(%arg0: i32) -> (i32, i32, i32) {
    %c0_i32 = arith.constant 0 : i32
    %c0_i32_0 = arith.constant 0 : i32
    %c0_i32_1 = arith.constant 0 : i32
    return %arg0, %c0_i32, %c0_i32_0 : i32, i32, i32
  }
}

</mosaic_0001>

<bundles_post_ra>
// kernel: lenet_forward.1
= control target key start
LH: loop header
LB: loop body
LE: loop exit
PB: predicated region body
PF: predicated region fallthrough
CT: control target
= control target key end

     0   :  { %s3911_s0 = inlined_call_operand.vmem [shape: f32[2,1,28,28], index: 0, kind: input, shape index: {}]   ;;  %s3912_s1 = inlined_call_operand.vmem [shape: bf16[5,28,144], index: 1, kind: input, shape index: {}]   ;;  %s3913_s2 = inlined_call_operand.hbm [shape: f32[1,144], index: 2, kind: input, shape index: {}]   ;;  %s3914_s3 = inlined_call_operand.hbm [shape: bf16[5,72,128], index: 3, kind: input, shape index: {}]   ;;  %s3915_s4 = inlined_call_operand.hbm [shape: f32[1,128], index: 4, kind: input, shape index: {}]   ;;  %s3916_s5 = inlined_call_operand.vmem [shape: f32[2,144,72], index: 5, kind: input, shape index: {}]   ;;  %s3917_s6 = inlined_call_operand.vmem [shape: f32[2,12,24], index: 6, kind: input, shape index: {}]   ;;  %s3918_s7 = inlined_call_operand.vmem [shape: f32[2,128,64], index: 7, kind: input, shape index: {}]   ;;  %s3919_s8 = inlined_call_operand.hbm [shape: f32[2,4,8], index: 8, kind: input, shape index: {}]   ;;  %s3920_s9 = inlined_call_operand.hbm [shape: bf16[4,64,120], index: 9, kind: input, shape index: {}]   ;;  %s3921_s10 = inlined_call_operand.hbm [shape: f32[1,120], index: 10, kind: input, shape index: {}]   ;;  %s3922_s11 = inlined_call_operand.vmem [shape: bf16[120,84], index: 11, kind: input, shape index: {}]   ;;  %s3923_s12 = inlined_call_operand.hbm [shape: f32[1,84], index: 12, kind: input, shape index: {}]   ;;  %s3924_s13 = inlined_call_operand.hbm [shape: bf16[84,128], index: 13, kind: input, shape index: {}]   ;;  %s3925_s14 = inlined_call_operand.hbm [shape: f32[1,128], index: 14, kind: input, shape index: {}]   ;;  %s3926_s15 = inlined_call_operand.hbm [shape: f32[2,1,128], index: 15, kind: output, shape index: {}]  }
   0x1   :  { %3936 = sst [smem:[#allocation31_spill]] %s3914_s3 }
   0x2   :  { %3937 = sst [smem:[#allocation32_spill]] %s3919_s8 }
   0x3   :  { %3938 = sst [smem:[#allocation33_spill]] %s3921_s10 }
   0x4   :  { %3939 = sst [smem:[#allocation34_spill]] %s3926_s15 }
   0x5   :  { %20 = vsyncpa [#allocation3], 0 }
   0x6   :  { %21 = vsyncpa [#allocation6], 0 }
   0x7   :  { %22 = vsyncpa [#allocation9], 0 }
   0x8   :  { %23 = vsyncpa [#allocation12], 0 }
   0x9   :  { %24 = vsyncpa [#allocation15], 0 }
   0xa   :  { %25 = vsyncpa [#allocation4], 0 }
   0xb   :  { %27 = vsyncpa [#allocation4 + $0x1], 0  ;;  %s3272_s18 = smov 0   ;;  %s3274_s19 = smov 0  }
   0xc   :  { %s3276_s20 = smov 0   ;;  %s3278_s21 = smov 0  }
   0xd LB: > { %3940 = sst [smem:[#allocation24_spill]] %s3167_s18  ;;  %s3293_s22 = sadd.s32 4294967295, %s3179_s21   ;;  %s3179_s21 = sphi %s3278_s21, %s3959_s21   ;;  %s3175_s20 = sphi %s3276_s20, %s3961_s20   ;;  %s3171_s19 = sphi %s3274_s19, %s3963_s19   ;;  %s3167_s18 = sphi %s3272_s18, %s3962_s18  }
   0xe   : > { %3941 = sst [smem:[#allocation25_spill]] %s3175_s20  ;;  %s2228_s23 = sadd.s32 4294967294, %s3179_s21  }
   0xf   : > { %3942 = sst [smem:[#allocation26_spill]] %s3179_s21  ;;  %s3297_s24 = sadd.s32 1, %s3179_s21  }
  0x10   : > { %3943 = sst [smem:[#allocation27_spill]] %s3297_s24  ;;  %s360_s25 = sadd.s32 1, %s3175_s20 }
  0x11   : > { %s357_s26 = ssub.s32 %s3179_s21, %s3297_s24  ;;  %p370_p0 = scmp.ne.s32.totalorder %s3175_s20, %s3171_s19 }
  0x12   : > { %p358_p1 = scmp.eq.s32.totalorder %s357_s26, 0  ;;  %p371_p2 = scmp.eq.s32.totalorder %s3293_s22, 1 }
  0x13   : > { %p376_p3 = scmp.ne.s32.totalorder %s3171_s19, %s3167_s18  ;;  %p377_p4 = scmp.eq.s32.totalorder %s2228_s23, 1 }
  0x14   : > { %s3308_s27 = scalar_select %p358_p1, %s3175_s20, %s360_s25  }
  0x15   : > { %p3310_p5 = por %p371_p2, %p370_p0  ;;  %p3314_p6 = por %p377_p4, %p376_p3 }
  0x16   : > { %3944 = sst [smem:[#allocation28_spill]] %s3308_s27  ;;  %p2229_p7 = scmp.ge.s32.totalorder %s3179_s21, 1 }
  0x17   : > { %s3945_s28 = scalar_select %p3310_p5, 1, 0 }
  0x18   : > { %s3947_s29 = scalar_select %p3314_p6, 1, 0 }
  0x19   : > { %3946 = sst [smem:[#allocation29_spill]] %s3945_s28  ;;  %p384_p8 = scmp.lt.s32.totalorder %s3179_s21, 3 }
  0x1a   : > { %3948 = sst [smem:[#allocation30_spill]] %s3947_s29  ;;  %p2764_p9 = scmp.eq.s32.totalorder %s3293_s22, 0 }
  0x1b   : > { %p3321_p10 = pnand %p2229_p7, %p384_p8  ;;  %s3950_s3 = sld [smem:[#allocation31_spill]] }
  0x1c   : > { %s3181_s25 = smov [#allocation5]   ;;  %s3952_s8 = sld [smem:[#allocation32_spill]] }
  0x1d   : > { %p2732_p11 = pneg %p3321_p10  ;;  %s412_s26 = sshll.u32 %s3181_s25, 4  ;;  %s413_s26 = int_to_ptr.vmem [resolvable:$true] %s412_s26 }
  0x1e   : > { %s3182_s16 = smov 64   ;;  %s3183_s17 = smov 4  }
  0x1f   : > { %p3332_p12 = pnand %p2764_p9, %p2732_p11  ;;  %s3184_s25 = smov [#allocation8]  }
  0x20   : > { %s3953_s10 = sld [smem:[#allocation33_spill]]  ;;  %s3185_s15 = smov [#allocation11]  }
  0x21   : > { %s410_s23 = sshll.u32 %s3950_s3, 4  ;;  %s447_s3 = sshll.u32 %s3184_s25, 4  ;;  %s411_s23 = int_to_ptr.hbm [resolvable:$true] %s410_s23  ;;  %s448_s3 = int_to_ptr.vmem [resolvable:$true] %s447_s3 }
  0x22   : > { %s445_s29 = sshll.u32 %s3952_s8, 4  ;;  %s500_s8 = sshll.u32 %s3924_s13, 4  ;;  %s446_s29 = int_to_ptr.hbm [resolvable:$true] %s445_s29  ;;  %s501_s8 = int_to_ptr.hbm [resolvable:$true] %s500_s8 }
  0x23   : > { %2738 = dma.hbm_to_vmem [thread:$0]  (!%p3332_p12), %s411_s23, 2880, %s413_s26, [#allocation6], %s3182_s16, %s3182_s16, %s3183_s17  }
  0x24   : > { %2744 = dma.hbm_to_vmem [thread:$0]  (!%p3332_p12), %s446_s29, 128, %s448_s3, [#allocation9], %s3182_s16, %s3182_s16, %s3183_s17  }
  0x25   : > { %s476_s23 = sshll.u32 %s3185_s15, 4  ;;  %s3186_s18 = smov [#allocation14]   ;;  %s477_s23 = int_to_ptr.vmem [resolvable:$true] %s476_s23 }
  0x26   : > { %s474_s28 = sshll.u32 %s3953_s10, 4  ;;  %s502_s21 = sshll.u32 %s3186_s18, 4  ;;  %s475_s28 = int_to_ptr.hbm [resolvable:$true] %s474_s28  ;;  %s503_s21 = int_to_ptr.vmem [resolvable:$true] %s502_s21 }
  0x27   : > { %2750 = dma.hbm_to_vmem [thread:$0]  (!%p3332_p12), %s475_s28, 16, %s477_s23, [#allocation12]  }
  0x28   : > { %s399_s10 = sshll.u32 %s3913_s2, 4  ;;  %s425_s29 = sshll.u32 %s3915_s4, 4  ;;  %s400_s10 = int_to_ptr.hbm [resolvable:$true] %s399_s10  ;;  %s426_s29 = int_to_ptr.hbm [resolvable:$true] %s425_s29 }
  0x29   : > { %2756 = dma.hbm_to_vmem [thread:$0]  (!%p3332_p12), %s501_s8, 704, %s503_s21, [#allocation15], %s3182_s16, %s3182_s16, %s3183_s17  }
  0x2a   : > { %s3187_s20 = smov [#allocation2]   ;;  %s3188_s24 = smov [#allocation7]  }
  0x2b   : > { %s401_s28 = sshll.u32 %s3187_s20, 4  ;;  %s427_s23 = sshll.u32 %s3188_s24, 4  ;;  %s402_s28 = int_to_ptr.vmem [resolvable:$true] %s401_s28  ;;  %s428_s23 = int_to_ptr.vmem [resolvable:$true] %s427_s23 }
  0x2c   : > { %2735 = dma.hbm_to_vmem [thread:$0]  (!%p3332_p12), %s400_s10, 32, %s402_s28, [#allocation3]  }
  0x2d   : > { %s459_s25 = sshll.u32 %s3920_s9, 4  ;;  %s489_s3 = sshll.u32 %s3923_s12, 4  ;;  %s460_s25 = int_to_ptr.hbm [resolvable:$true] %s459_s25  ;;  %s490_s3 = int_to_ptr.hbm [resolvable:$true] %s489_s3 }
  0x2e   : > { %2741 = dma.hbm_to_vmem [thread:$0]  (!%p3332_p12), %s426_s29, 16, %s428_s23, [#allocation6]  }
  0x2f   : > { %s3189_s15 = smov [#allocation10]   ;;  %s3190_s10 = smov [#allocation13]  }
  0x30   : > { %s461_s20 = sshll.u32 %s3189_s15, 4  ;;  %s491_s28 = sshll.u32 %s3190_s10, 4  ;;  %s462_s20 = int_to_ptr.vmem [resolvable:$true] %s461_s20  ;;  %s492_s28 = int_to_ptr.vmem [resolvable:$true] %s491_s28 }
  0x31   : > { %2747 = dma.hbm_to_vmem [thread:$0]  (!%p3332_p12), %s460_s25, 2048, %s462_s20, [#allocation9], %s3182_s16, %s3182_s16, %s3183_s17  }
  0x32   : > { %s515_s29 = sshll.u32 %s3925_s14, 4  ;;  %s3191_s23 = smov [#allocation16]   ;;  %s516_s29 = int_to_ptr.hbm [resolvable:$true] %s515_s29 }
  0x33   : > { %2753 = dma.hbm_to_vmem [thread:$0]  (!%p3332_p12), %s490_s3, 16, %s492_s28, [#allocation12]  }
  0x34   : > { %s517_s26 = sshll.u32 %s3191_s23, 4  ;;  %538 = sbr.rel (%p3321_p10) target bundleno = 1452 (0x5ac), region = 80  ;;  %s518_s26 = int_to_ptr.vmem [resolvable:$true] %s517_s26 }
  0x35   : > { %2759 = dma.hbm_to_vmem [thread:$0]  (!%p3332_p12), %s516_s29, 16, %s518_s26, [#allocation15]  }
  0x39   : > { %3142 = dma.done.wait (%p2764_p9), [#allocation3], 32  }
  0x3a   : > { %3144 = vsyncadd (%p2764_p9), [#allocation3], 4294967264 }
  0x3b   : > { %3146 = dma.done.wait (%p2764_p9), [#allocation6], 2896  }
  0x3c   : > { %3148 = vsyncadd (%p2764_p9), [#allocation6], 4294964400 }
  0x3d   : > { %3150 = dma.done.wait (%p2764_p9), [#allocation9], 2176  }
  0x3e   : > { %3152 = vsyncadd (%p2764_p9), [#allocation9], 4294965120 }
  0x3f   : > { %3154 = dma.done.wait (%p2764_p9), [#allocation12], 32  }
  0x40   : > { %3156 = vsyncadd (%p2764_p9), [#allocation12], 4294967264 }
  0x41   : > { %3158 = dma.done.wait (%p2764_p9), [#allocation15], 720  }
  0x42   : > { %3160 = vsyncadd (%p2764_p9), [#allocation15], 4294966576  ;;  %p626_p13 = scmp.lt.s32.totalorder %s3293_s22, 1  ;;  %vm689_vm0 = vcmask 1045504   ;;  %v2266_v0 = vld [vmem:[%s3912_s1 + $0x30] sm:$0xf] }
  0x43   : > { %v2629_v1 = vld [vmem:[%s3912_s1 + $0x34] sm:$0x30]  ;;  %v2628_v2 = vld [vmem:[%s3912_s1 + $0x34] sm:$0xf]  ;;  %v2268_v4 = vld [vmem:[%s3912_s1 + $0x38] sm:$0x30] }
  0x44   : > { %s627_s27 = scalar_select %p626_p13, %s3293_s22, 1  ;;  %v2267_v3 = vor.u32 %v2629_v1, %v2266_v0  ;;  %v2258_v5 = vld [vmem:[%s3912_s1 + $0x20] sm:$0xf]  ;;  %v2627_v6 = vld [vmem:[%s3912_s1 + $0x24] sm:$0xf0]  ;;  %v2271_v7 = vor.u32 %v2628_v2, %v2268_v4  ;;  %vm682_vm2 = vcmask 228352  }
  0x45   : > { %v2626_v8 = vld [vmem:[%s3912_s1 + $0x24] sm:$0xf]  ;;  %v2260_v9 = vld [vmem:[%s3912_s1 + $0x28] sm:$0xf0]  ;;  %v2259_v16 = vor.u32 %v2627_v6, %v2258_v5  ;;  %v2286_v19 = vld [vmem:[%s3912_s1 + $0x10] sm:$0xf] }
  0x46   : > { %s2621_s30 = sshll.u32 %s627_s27, 5  ;;  %v691_v11 = vsel %vm689_vm0, %v2267_v3, 0  ;;  %v694_v15 = vsel %vm689_vm0, %v2271_v7, 0  ;;  %v2625_v20 = vld [vmem:[%s3912_s1 + $0x14] sm:$0x30]  ;;  %v2263_v21 = vor.u32 %v2626_v8, %v2260_v9  ;;  %vm804_vm3 = vcmask 1046528  }
  0x47   : > { %s630_s25 = scalar_lea.vmem %s3911_s0, %s2621_s30  ;;  %702 = vmatpush.bf16.msra.mxu0 %v691_v11  ;;  %2690 = vmatpush.bf16.msra.mxu2 %v691_v11  ;;  %v2287_v22 = vor.u32 %v2625_v20, %v2286_v19  ;;  %v2624_v23 = vld [vmem:[%s3912_s1 + $0x14] sm:$0xf]  ;;  %v2288_v24 = vld [vmem:[%s3912_s1 + $0x18] sm:$0x30]  ;;  %v2310_v25 = vld [vmem:[%s3912_s1 + $0x50] sm:$0xf] }
  0x48   : > { %v632_v10 = vld [vmem:[%s630_s25] sm:$0xff]  ;;  %v633_v12 = vld [vmem:[%s630_s25 + $0x8] sm:$0xff]  ;;  %v3442_v13 = vld [vmem:[%s630_s25 + $0x10] sm:$0xff]  ;;  %2692 = vmatpush.bf16.msra.mxu3 %v694_v15  ;;  %720 = vmatpush.bf16.msra.mxu1 %v694_v15  ;;  %v2291_v32 = vor.u32 %v2624_v23, %v2288_v24  ;;  %vm648_vm1 = vsmask.f32 7424  ;;  %vm1082_vm5 = vcmask 130048  }
  0x49   : > { %v635_v14 = vld [vmem:[%s630_s25 + $0x18] sm:$0xf]  ;;  %v3445_v17 = vpack.c.bf16 %v633_v12, %v632_v10  ;;  %v756_v31 = vsel %vm689_vm0, %v2287_v22, 0  ;;  %v2278_v34 = vld [vmem:[%s3912_s1] sm:$0xf]  ;;  %vm1343_vm6 = vcmask 1043456  }
  0x4a   : > { %v3448_v18 = vpack.c.bf16 %v635_v14, %v3442_v13  ;;  %v2633_v30 = vld [vmem:[%s3912_s1 + $0x54] sm:$0x30]  ;;  %v2623_v35 = vld [vmem:[%s3912_s1 + $0x4] sm:$0xf0]  ;;  %v2622_v38 = vld [vmem:[%s3912_s1 + $0x4] sm:$0xf] }
  0x4b   : > { %v650_v26 = vshrl.u32 %v3445_v17, 16  ;;  %v652_v27 = vshll.u32 %v3445_v17, 16  ;;  %v2311_v33 = vor.u32 %v2633_v30, %v2310_v25  ;;  %703 = vmatpush.bf16.msra.mxu0 %v2259_v16  ;;  %2691 = vmatpush.bf16.msra.mxu2 %v2259_v16  ;;  %v759_v39 = vsel %vm689_vm0, %v2291_v32, 0  ;;  %v2280_v42 = vld [vmem:[%s3912_s1 + $0x8] sm:$0xf0]  ;;  %s624_s15 = sand.u32 1, %s3171_s19  }
  0x4c   : > { %v657_v28 = vshll.u32 %v3448_v18, 16  ;;  %v661_v29 = vshrl.u32 %v3448_v18, 16  ;;  %2693 = vmatpush.bf16.msra.mxu3 %v2263_v21  ;;  %721 = vmatpush.bf16.msra.mxu1 %v2263_v21  ;;  %v2279_v41 = vor.u32 %v2623_v35, %v2278_v34  ;;  %v2283_v45 = vor.u32 %v2622_v38, %v2280_v42  ;;  %v2302_v46 = vld [vmem:[%s3912_s1 + $0x40] sm:$0xf]  ;;  %v2631_v47 = vld [vmem:[%s3912_s1 + $0x44] sm:$0xf0] }
  0x4d   : > { %v654_v36 = vrot.slane %v652_v27, 1  ;;  %v833_v40 = vsel %vm689_vm0, %v2311_v33, 0  ;;  %v2303_v48 = vor.u32 %v2631_v47, %v2302_v46  ;;  %v2632_v49 = vld [vmem:[%s3912_s1 + $0x54] sm:$0xf]  ;;  %v2312_v50 = vld [vmem:[%s3912_s1 + $0x58] sm:$0x30] }
  0x4e   : > { %v659_v37 = vrot.slane %v657_v28, 1  ;;  %v2315_v52 = vor.u32 %v2632_v49, %v2312_v50  ;;  %v2630_v53 = vld [vmem:[%s3912_s1 + $0x44] sm:$0xf]  ;;  %v2304_v54 = vld [vmem:[%s3912_s1 + $0x48] sm:$0xf0]  ;;  %v805_v15 = vrot.slane %v3445_v17, 1 }
  0x4f   : > { %v655_v43 = vor.u32 %v654_v36, %v650_v26  ;;  %767 = vmatpush.bf16.msrb.mxu2 %v756_v31  ;;  %844 = vmatpush.bf16.msrb.mxu0 %v833_v40  ;;  %v2334_v55 = vld [vmem:[%s3912_s1 + $0x70] sm:$0xf]  ;;  %v2637_v56 = vld [vmem:[%s3912_s1 + $0x74] sm:$0x30]  ;;  %v2636_v57 = vld [vmem:[%s3912_s1 + $0x74] sm:$0xf]  ;;  %v2307_v62 = vor.u32 %v2630_v53, %v2304_v54  ;;  %v637_v31 = vpack.c.bf16 %v3442_v13, %v3442_v13 }
  0x50   : > { %v663_v44 = vor.u32 %v661_v29, %v659_v37  ;;  %785 = vmatpush.bf16.msrb.mxu3 %v759_v39  ;;  %v836_v58 = vsel %vm689_vm0, %v2315_v52, 0  ;;  %v2335_v59 = vor.u32 %v2637_v56, %v2334_v55  ;;  %v2336_v60 = vld [vmem:[%s3912_s1 + $0x78] sm:$0x30]  ;;  %v2358_v61 = vld [vmem:[%s3912_s1 + $0x90] sm:$0xf]  ;;  %v806_v16 = vrot.slane %v3448_v18, 1 }
  0x51   : > { %v660_v51 = vsel %vm648_vm1, %v655_v43, %v659_v37  ;;  %862 = vmatpush.bf16.msrb.mxu1 %v836_v58  ;;  %v2339_v63 = vor.u32 %v2636_v57, %v2336_v60  ;;  %v2641_v0 = vld [vmem:[%s3912_s1 + $0x94] sm:$0x30]  ;;  %v2326_v1 = vld [vmem:[%s3912_s1 + $0x60] sm:$0xf]  ;;  %v2635_v2 = vld [vmem:[%s3912_s1 + $0x64] sm:$0xf0] }
  0x52   : > { %2273 = vmatmul.msk.bf16.vlgmr.msra.gmra.mxu2 %vm682_vm2, %v663_v44  ;;  %2275 = vmatmul.msk.bf16.vlgmr.msra.gmra.mxu3 %vm682_vm2, %v663_v44  ;;  %v918_v3 = vsel %vm689_vm0, %v2335_v59, 0  ;;  %v2359_v4 = vor.u32 %v2641_v0, %v2358_v61  ;;  %v2634_v5 = vld [vmem:[%s3912_s1 + $0x64] sm:$0xf]  ;;  %v2328_v6 = vld [vmem:[%s3912_s1 + $0x68] sm:$0xf0]  ;;  %v2327_v8 = vor.u32 %v2635_v2, %v2326_v1  ;;  %v807_v19 = vsel %vm804_vm3, %v805_v15, %v806_v16  ;;  %v2384_v42 = vld [vmem:[%s3916_s5 + $0xf8] sm:$0xff] }
  0x53   : > { %2272 = vmatmul.msk.bf16.vlgmr.msra.gmra.mxu0 %vm682_vm2, %v660_v51  ;;  %2274 = vmatmul.msk.bf16.vlgmr.msra.gmra.mxu1 %vm682_vm2, %v660_v51  ;;  %v921_v7 = vsel %vm689_vm0, %v2339_v63, 0  ;;  %v2350_v9 = vld [vmem:[%s3912_s1 + $0x80] sm:$0xf]  ;;  %v2639_v10 = vld [vmem:[%s3912_s1 + $0x84] sm:$0xf0]  ;;  %v2331_v12 = vor.u32 %v2634_v5, %v2328_v6  ;;  %v886_v32 = vrot.slane %v650_v26, 1 }
  0x54   : > { %768 = vmatpush.bf16.msrb.mxu2 %v2279_v41  ;;  %786 = vmatpush.bf16.msrb.mxu3 %v2283_v45  ;;  %v999_v11 = vsel %vm689_vm0, %v2359_v4, 0  ;;  %v2351_v14 = vor.u32 %v2639_v10, %v2350_v9  ;;  %v2640_v20 = vld [vmem:[%s3912_s1 + $0x94] sm:$0xf]  ;;  %v2360_v21 = vld [vmem:[%s3912_s1 + $0x98] sm:$0x30]  ;;  %v890_v33 = vrot.slane %v657_v28, 2 }
  0x55   : > { %845 = vmatpush.bf16.msrb.mxu0 %v2303_v48  ;;  %863 = vmatpush.bf16.msrb.mxu1 %v2307_v62  ;;  %v2363_v22 = vor.u32 %v2640_v20, %v2360_v21  ;;  %v2638_v24 = vld [vmem:[%s3912_s1 + $0x84] sm:$0xf]  ;;  %v2352_v25 = vld [vmem:[%s3912_s1 + $0x88] sm:$0xf0]  ;;  %v889_v34 = vrot.slane %v661_v29, 1  ;;  %v887_v13 = vrot.slane %v652_v27, 2 }
  0x56   : > { %v2355_v30 = vor.u32 %v2638_v24, %v2352_v25  ;;  %vm885_vm4 = vsmask.f32 6400  ;;  %v971_v37 = vrot.slane %v3445_v17, 2  ;;  %v972_v38 = vrot.slane %v3448_v18, 2  ;;  %v2386_v18 = vld [vmem:[%s3916_s5 + $0x108] sm:$0xff]  ;;  %v1078_v28 = vld [vmem:[%s3916_s5 + $0x70] sm:$0xff] }
  0x57   : > { %v1002_v23 = vsel %vm689_vm0, %v2363_v22, 0  ;;  %v891_v35 = vor.u32 %v890_v33, %v889_v34  ;;  %v888_v36 = vor.u32 %v887_v13, %v886_v32  ;;  %v2385_v29 = vld [vmem:[%s3916_s5 + $0x100] sm:$0xff]  ;;  %v1077_v41 = vld [vmem:[%s3916_s5 + $0x68] sm:$0xff]  ;;  %v2383_v46 = vld [vmem:[%s3916_s5 + $0xf0] sm:$0xff]  ;;  %vm1220_vm7 = vcmask 195584   ;;  %s3954_s10 = sld [smem:[#allocation34_spill]] }
  0x58   : > { %929 = vmatpush.bf16.msra.mxu2 %v918_v3  ;;  %947 = vmatpush.bf16.msra.mxu3 %v921_v7  ;;  %v973_v40 = vsel %vm689_vm0, %v971_v37, %v972_v38  ;;  %v1076_v45 = vld [vmem:[%s3916_s5 + $0x60] sm:$0xff]  ;;  %v1075_v47 = vld [vmem:[%s3916_s5 + $0x58] sm:$0xff]  ;;  %v2382_v48 = vld [vmem:[%s3916_s5 + $0xe8] sm:$0xff]  ;;  %vm1339_vm8 = vcmask 588800   ;;  %vm1664_vm9 = vcmask 64512   ;;  %vm1759_vm10 = vcmask 523264  }
  0x59   : > { %1010 = vmatpush.bf16.msra.mxu0 %v999_v11  ;;  %1028 = vmatpush.bf16.msra.mxu1 %v1002_v23  ;;  %v892_v39 = vsel %vm885_vm4, %v888_v36, %v891_v35  ;;  %v1074_v51 = vld [vmem:[%s3916_s5 + $0x50] sm:$0xff]  ;;  %v2381_v52 = vld [vmem:[%s3916_s5 + $0xe0] sm:$0xff]  ;;  %v1073_v53 = vld [vmem:[%s3916_s5 + $0x48] sm:$0xff]  ;;  %vm2054_vm11 = vcmask 1041408   ;;  %vm1983_vm12 = vcmask 982016   ;;  %vm2050_vm13 = vcmask 687104  }
  0x5a   : > { %v2380_v54 = vld [vmem:[%s3916_s5 + $0xd8] sm:$0xff]  ;;  %v1072_v57 = vld [vmem:[%s3916_s5 + $0x40] sm:$0xff]  ;;  %v2379_v58 = vld [vmem:[%s3916_s5 + $0xd0] sm:$0xff]  ;;  %s625_s18 = scalar_lea.vmem [#allocation17], %s624_s15  ;;  %s2073_s26 = scalar_lea.sflag [#allocation4], %s624_s15 }
  0x5b   : > { %v1071_v59 = vld [vmem:[%s3916_s5 + $0x38] sm:$0xff]  ;;  %v2378_v60 = vld [vmem:[%s3916_s5 + $0xc8] sm:$0xff]  ;;  %v1070_v63 = vld [vmem:[%s3916_s5 + $0x30] sm:$0xff]  ;;  %s2083_s29 = sshll.u32 %s625_s18, 4  ;;  %s2084_s29 = int_to_ptr.vmem [resolvable:$true] %s2083_s29 }
  0x5c   : > { %930 = vmatpush.bf16.msra.mxu2 %v2327_v8  ;;  %948 = vmatpush.bf16.msra.mxu3 %v2331_v12  ;;  %v2377_v0 = vld [vmem:[%s3916_s5 + $0xc0] sm:$0xff]  ;;  %v1069_v1 = vld [vmem:[%s3916_s5 + $0x28] sm:$0xff]  ;;  %v2376_v2 = vld [vmem:[%s3916_s5 + $0xb8] sm:$0xff] }
  0x5d   : > { %1011 = vmatpush.bf16.msra.mxu0 %v2351_v14  ;;  %1029 = vmatpush.bf16.msra.mxu1 %v2355_v30  ;;  %v1068_v5 = vld [vmem:[%s3916_s5 + $0x20] sm:$0xff]  ;;  %v2375_v6 = vld [vmem:[%s3916_s5 + $0xb0] sm:$0xff]  ;;  %v1067_v7 = vld [vmem:[%s3916_s5 + $0x18] sm:$0xff]  ;;  %s2081_s24 = scalar_lea.hbm %s3954_s10, %s3293_s22  ;;  %s3117_s22 = scalar_lea.hbm %s3954_s10, 2 }
  0x5e   : > { %v2374_v8 = vld [vmem:[%s3916_s5 + $0xa8] sm:$0xff]  ;;  %v1066_v11 = vld [vmem:[%s3916_s5 + $0x10] sm:$0xff]  ;;  %v2373_v12 = vld [vmem:[%s3916_s5 + $0xa0] sm:$0xff]  ;;  %s2085_s23 = sshll.u32 %s2081_s24, 4  ;;  %s2086_s23 = int_to_ptr.hbm [resolvable:$true] %s2085_s23 }
  0x5f   : > { %v1065_v14 = vld [vmem:[%s3916_s5 + $0x8] sm:$0xff]  ;;  %v1064_v21 = vld [vmem:[%s3916_s5] sm:$0xff]  ;;  %v2371_v23 = vld [vmem:[%s3916_s5 + $0x90] sm:$0xff]  ;;  %s3111_s27 = sshra.s32 %s2086_s23, 4  ;;  %s3112_s27 = int_to_ptr.hbm [resolvable:$true] %s3111_s27 }
  0x60   : > { %v1081_v15 = vld [vmem:[%s3916_s5 + $0x88] sm:$0xff]  ;;  %v1080_v22 = vld [vmem:[%s3916_s5 + $0x80] sm:$0xff]  ;;  %v2387_v36 = vld [vmem:[%s3916_s5 + $0x110] sm:$0xff]  ;;  %s3113_s30 = scalar_lea.hbm %s3112_s27, 1  ;;  %p3118_p3 = scmp.lt.s32.totalorder %s3112_s27, %s3954_s10 }
  0x61   : > { %p3114_p0 = scmp.ne.s32.totalorder %s3112_s27, %s3113_s30  ;;  %p3119_p4 = scmp.lt.s32.totalorder %s3117_s22, %s3113_s30 }
  0x62   : > { %2292 = vmatmul.msk.bf16.vlgmr.msrb.gmra.mxu2 %vm682_vm2, %v3445_v17  ;;  %2294 = vmatmul.msk.bf16.vlgmr.msrb.gmra.mxu3 %vm682_vm2, %v3445_v17  ;;  %v1079_v17 = vld [vmem:[%s3916_s5 + $0x78] sm:$0xff] }
  0x63   : > { %2316 = vmatmul.msk.bf16.vlgmr.msrb.gmra.mxu0 %vm682_vm2, %v807_v19  ;;  %2318 = vmatmul.msk.bf16.vlgmr.msrb.gmra.mxu1 %vm682_vm2, %v807_v19  ;;  %p3115_p1 = pnand %p3114_p0, %p3310_p5  ;;  %p3120_p7 = por %p3119_p4, %p3118_p3 }
  0x64   : > { %1092 = vmatpush.msrb.mxu2 %v1079_v17  ;;  %1163 = vmatpush.msrb.mxu0 %v2386_v18  ;;  %v1046_v17 = vld [vmem:[#allocation2] sm:$0x3] }
  0x65   : > { %1132 = vmatpush.msrb.mxu3 %v1081_v15  ;;  %p3116_p2 = pneg %p3115_p1 }
  0x66   : > { %1093 = vmatpush.msrb.mxu2 %v1078_v28  ;;  %1164 = vmatpush.msrb.mxu0 %v2385_v29 }
  0x67   : > { %1133 = vmatpush.msrb.mxu3 %v1080_v22  ;;  %p3121_p8 = pnand %p3120_p7, %p3116_p2 }
  0x68   : > { %1094 = vmatpush.msrb.mxu2 %v1077_v41  ;;  %1165 = vmatpush.msrb.mxu0 %v2384_v42 }
  0x6a   : > { %1095 = vmatpush.msrb.mxu2 %v1076_v45  ;;  %1166 = vmatpush.msrb.mxu0 %v2383_v46  ;;  %v1048_v45 = vperm.slane %v1046_v17, 0 }
  0x6c   : > { %1096 = vmatpush.msrb.mxu2 %v1075_v47  ;;  %1167 = vmatpush.msrb.mxu0 %v2382_v48  ;;  %v1049_v47 = vperm.slane %v1046_v17, 1  ;;  %v2645_v17 = vld [vmem:[#allocation5 + $0x18] sm:$0xff] }
  0x6e   : > { %1097 = vmatpush.msrb.mxu2 %v1074_v51  ;;  %1168 = vmatpush.msrb.mxu0 %v2381_v52 }
  0x70   : > { %1098 = vmatpush.msrb.mxu2 %v1073_v53  ;;  %1169 = vmatpush.msrb.mxu0 %v2380_v54 }
  0x72   : > { %2293 = vmatmul.msk.bf16.gmra.mxu2 %vm682_vm2, %v637_v31  ;;  %2295 = vmatmul.msk.bf16.gmra.mxu3 %vm682_vm2, %v637_v31 }
  0x73   : > { %2317 = vmatmul.msk.bf16.gmra.mxu0 %vm682_vm2, %v806_v16  ;;  %2319 = vmatmul.msk.bf16.gmra.mxu1 %vm682_vm2, %v806_v16  ;;  %v2372_v16 = vld [vmem:[%s3916_s5 + $0x98] sm:$0xff] }
  0x74   : > { %1099 = vmatpush.msrb.mxu2 %v1072_v57  ;;  %1170 = vmatpush.msrb.mxu0 %v2379_v58 }
  0x76   : > { %1100 = vmatpush.msrb.mxu2 %v1071_v59  ;;  %1171 = vmatpush.msrb.mxu0 %v2378_v60 }
  0x78   : > { %1101 = vmatpush.msrb.mxu2 %v1070_v63  ;;  %1172 = vmatpush.msrb.mxu0 %v2377_v0 }
  0x7a   : > { %1102 = vmatpush.msrb.mxu2 %v1069_v1  ;;  %1173 = vmatpush.msrb.mxu0 %v2376_v2 }
  0x7c   : > { %1103 = vmatpush.msrb.mxu2 %v1068_v5  ;;  %1174 = vmatpush.msrb.mxu0 %v2375_v6 }
  0x7e   : > { %1104 = vmatpush.msrb.mxu2 %v1067_v7  ;;  %1175 = vmatpush.msrb.mxu0 %v2374_v8 }
  0x80   : > { %1105 = vmatpush.msrb.mxu2 %v1066_v11  ;;  %1176 = vmatpush.msrb.mxu0 %v2373_v12 }
  0x82   : > { %2340 = vmatmul.msk.bf16.vlgmr.msra.gmra.mxu2 %vm682_vm2, %v892_v39  ;;  %2342 = vmatmul.msk.bf16.vlgmr.msra.gmra.mxu3 %vm682_vm2, %v892_v39 }
  0x83   : > { %2364 = vmatmul.msk.bf16.vlgmr.msra.gmra.mxu0 %vm682_vm2, %v973_v40  ;;  %2366 = vmatmul.msk.bf16.vlgmr.msra.gmra.mxu1 %vm682_vm2, %v973_v40 }
  0x84   : > { %1106 = vmatpush.msrb.mxu2 %v1065_v14  ;;  %1177 = vmatpush.msrb.mxu0 %v2372_v16 }
  0x86   : > { %1107 = vmatpush.msrb.mxu2 %v1064_v21  ;;  %1178 = vmatpush.msrb.mxu0 %v2371_v23 }
  0x92   : > { %2341 = vmatmul.msk.bf16.gmra.mxu2 %vm682_vm2, %v891_v35  ;;  %2343 = vmatmul.msk.bf16.gmra.mxu3 %vm682_vm2, %v891_v35  ;;  %v2388_v35 = vld [vmem:[%s3916_s5 + $0x118] sm:$0xff] }
  0x93   : > { %2365 = vmatmul.msk.bf16.gmra.mxu0 %vm682_vm2, %v972_v38  ;;  %2367 = vmatmul.msk.bf16.gmra.mxu1 %vm682_vm2, %v972_v38 }
  0x94   : > { %1203 = vmatpush.msra.mxu2 %v2388_v35 }
  0x96   : > { %1204 = vmatpush.msra.mxu2 %v2387_v36 }
  0xd0   : > { %v3610_v26 = vpop.f32.mrf.mxu0  ;;  %v3612_v27 = vpop.f32.mrf.mxu1 }
  0xd5   : > { %v3626_v43 = vpop.f32.mrf.mxu2  ;;  %v3628_v44 = vpop.f32.mrf.mxu3 }
  0xd8   : > { %v3642_v49 = vpop.f32.mrf.mxu0  ;;  %v3644_v50 = vpop.f32.mrf.mxu1 }
  0xdd   : > { %v712_v55 = vpop.f32.mrf.mxu2  ;;  %v730_v56 = vpop.f32.mrf.mxu3 }
  0xe0   : > { %v847_v61 = vpop.f32.mrf.mxu0  ;;  %v865_v62 = vpop.f32.mrf.mxu1 }
  0xe5   : > { %v770_v3 = vpop.f32.mrf.mxu2  ;;  %v788_v4 = vpop.f32.mrf.mxu3 }
  0xe6   : > { %v771_v37 = vadd.f32 %v770_v3, %v3610_v26  ;;  %v789_v38 = vadd.f32 %v788_v4, %v3612_v27 }
  0xe8   : > { %v849_v9 = vpop.f32.mrf.mxu0  ;;  %v867_v10 = vpop.f32.mrf.mxu1  ;;  %v875_v18 = vadd.f32 %v865_v62, %v789_v38  ;;  %v874_v28 = vadd.f32 %v847_v61, %v771_v37 }
  0xed   : > { %v772_v19 = vpop.f32.mrf.mxu2  ;;  %v790_v20 = vpop.f32.mrf.mxu3 }
  0xee   : > { %v773_v48 = vadd.f32 %v772_v19, %v3642_v49  ;;  %v791_v51 = vadd.f32 %v790_v20, %v3644_v50 }
  0xf0   : > { %v852_v24 = vpop.f32.mrf.mxu0  ;;  %v870_v25 = vpop.f32.mrf.mxu1  ;;  %v877_v56 = vadd.f32 %v867_v10, %v791_v51  ;;  %v876_v59 = vadd.f32 %v849_v9, %v773_v48 }
  0xf5   : > { %v775_v30 = vpop.f32.mrf.mxu2  ;;  %v793_v31 = vpop.f32.mrf.mxu3 }
  0xf6   : > { %v776_v49 = vadd.f32 %v775_v30, %v3626_v43  ;;  %v794_v50 = vadd.f32 %v793_v31, %v3628_v44 }
  0xf8   : > { %v854_v32 = vpop.f32.mrf.mxu0  ;;  %v872_v33 = vpop.f32.mrf.mxu1  ;;  %v879_v6 = vadd.f32 %v870_v25, %v794_v50  ;;  %v878_v8 = vadd.f32 %v852_v24, %v776_v49  ;;  %v1219_v49 = vld [vmem:[%s3917_s6 + $0x8] sm:$0xf]  ;;  %v2395_v50 = vld [vmem:[%s3917_s6 + $0x18] sm:$0xf] }
  0xfd   : > { %v777_v34 = vpop.f32.mrf.mxu2  ;;  %v795_v13 = vpop.f32.mrf.mxu3 }
  0xfe   : > { %v1293_v13 = vld [vmem:[#allocation5 + $0x20] sm:$0xf] }
  0xff   : > { %v1377_v35 = vunpack.c.l.b16 %v1293_v13 }
 0x100   : > { %v1013_v39 = vpop.f32.mrf.mxu0  ;;  %v1031_v40 = vpop.f32.mrf.mxu1 }
 0x101   : > { %v1382_v37 = vpack.c.b16 %v1377_v35, %v1377_v35 }
 0x105   : > { %v932_v29 = vpop.f32.mrf.mxu2  ;;  %v950_v41 = vpop.f32.mrf.mxu3 }
 0x106   : > { %v959_v42 = vadd.f32 %v932_v29, %v874_v28  ;;  %v960_v46 = vadd.f32 %v950_v41, %v875_v18  ;;  %v2644_v18 = vld [vmem:[#allocation5 + $0x10] sm:$0xff]  ;;  %v1415_v28 = vld [vmem:[#allocation5 + $0x68] sm:$0xf]  ;;  %v1304_v29 = vld [vmem:[#allocation5 + $0x44] sm:$0xf] }
 0x107   : > { %v1329_v48 = vunpack.c.l.b16 %v1304_v29 }
 0x108   : > { %v1040_v26 = vadd.f32 %v1013_v39, %v959_v42  ;;  %v1015_v52 = vpop.f32.mrf.mxu0  ;;  %v1041_v27 = vadd.f32 %v1031_v40, %v960_v46  ;;  %v1033_v53 = vpop.f32.mrf.mxu1  ;;  %v1391_v39 = vsel %vm1343_vm6, %v1382_v37, 0  ;;  %v1435_v46 = vunpack.c.l.b16 %v1415_v28 }
 0x10a   : > { %v1052_v54 = vadd.f32 %v1048_v45, %v1040_v26  ;;  %v1053_v55 = vadd.f32 %v1049_v47, %v1041_v27 }
 0x10c   : > { %v1058_v57 = vmax.f32 %v1052_v54, 0.0  ;;  %v1059_v58 = vmax.f32 %v1053_v55, 0.0  ;;  %v1440_v55 = vpack.c.b16 %v1435_v46, %v1435_v46  ;;  %v1603_v46 = vld [vmem:[%s3918_s7 + $0x70] sm:$0xff] }
 0x10d   : > { %v934_v60 = vpop.f32.mrf.mxu2  ;;  %v952_v61 = vpop.f32.mrf.mxu3 }
 0x10e   : > { %v961_v62 = vadd.f32 %v934_v60, %v876_v59  ;;  %v962_v63 = vadd.f32 %v952_v61, %v877_v56  ;;  %1108 = vmatmul.f32.vlgmr.msrb.gmra.mxu2 %v1058_v57  ;;  %2368 = vmatmul.msk.f32.vlgmr.msrb.gmra.mxu3 %vm1082_vm5, %v1059_v58  ;;  %v1334_v56 = vpack.c.b16 %v1329_v48, %v1329_v48  ;;  %v1218_v60 = vld [vmem:[%s3917_s6] sm:$0xff]  ;;  %v2394_v61 = vld [vmem:[%s3917_s6 + $0x10] sm:$0xff]  ;;  %v1602_v48 = vld [vmem:[%s3918_s7 + $0x68] sm:$0xff] }
 0x10f   : > { %1179 = vmatmul.f32.vlgmr.msrb.gmra.mxu0 %v1058_v57  ;;  %1396 = vmatpush.bf16.msrb.mxu2 %v1391_v39 }
 0x110   : > { %v1042_v0 = vadd.f32 %v1015_v52, %v961_v62  ;;  %v1018_v1 = vpop.f32.mrf.mxu0  ;;  %v1043_v2 = vadd.f32 %v1033_v53, %v962_v63  ;;  %v1036_v3 = vpop.f32.mrf.mxu1  ;;  %v1449_v62 = vsel %vm1343_vm6, %v1440_v55, 0  ;;  %v1345_v63 = vsel %vm1343_vm6, %v1334_v56, 0  ;;  %v2493_v55 = vld [vmem:[%s3918_s7 + $0xd0] sm:$0xff]  ;;  %v1598_v56 = vld [vmem:[%s3918_s7 + $0x48] sm:$0xff] }
 0x112   : > { %v1055_v4 = vadd.f32 %v1049_v47, %v1043_v2  ;;  %v1054_v5 = vadd.f32 %v1048_v45, %v1042_v0  ;;  %v1474_v0 = vld [vmem:[#allocation5 + $0x8c] sm:$0xf] }
 0x113   : > { %1397 = vmatpush.bf16.msrb.mxu2 %v2645_v17 }
 0x114   : > { %v1061_v7 = vmax.f32 %v1055_v4, 0.0  ;;  %v1060_v9 = vmax.f32 %v1054_v5, 0.0  ;;  %v2642_v5 = vld [vmem:[#allocation5] sm:$0xff] }
 0x115   : > { %v937_v10 = vpop.f32.mrf.mxu2  ;;  %v955_v11 = vpop.f32.mrf.mxu3 }
 0x116   : > { %v963_v12 = vadd.f32 %v937_v10, %v878_v8  ;;  %v964_v14 = vadd.f32 %v955_v11, %v879_v6  ;;  %1111 = vmatmul.f32.gmra.mxu2 %v1060_v9  ;;  %2369 = vmatmul.msk.f32.gmra.mxu3 %vm1082_vm5, %v1061_v7  ;;  %v2649_v6 = vld [vmem:[#allocation5 + $0x3c] sm:$0xff]  ;;  %v2657_v8 = vld [vmem:[#allocation5 + $0x84] sm:$0xff]  ;;  %v2651_v10 = vld [vmem:[#allocation5 + $0x50] sm:$0xff] }
 0x117   : > { %1182 = vmatmul.f32.gmra.mxu0 %v1060_v9  ;;  %1398 = vmatpush.bf16.msrb.mxu2 %v2644_v18  ;;  %v2648_v9 = vld [vmem:[#allocation5 + $0x34] sm:$0xff]  ;;  %v2656_v11 = vld [vmem:[#allocation5 + $0x7c] sm:$0xff] }
 0x118   : > { %v1044_v43 = vadd.f32 %v1018_v1, %v963_v12  ;;  %v1020_v44 = vpop.f32.mrf.mxu0  ;;  %v1045_v15 = vadd.f32 %v1036_v3, %v964_v14  ;;  %v1038_v16 = vpop.f32.mrf.mxu1  ;;  %v1495_v1 = vunpack.c.l.b16 %v1474_v0  ;;  %v2653_v3 = vld [vmem:[#allocation5 + $0x60] sm:$0xff]  ;;  %v2647_v12 = vld [vmem:[#allocation5 + $0x2c] sm:$0xff] }
 0x119   : > { %v2650_v14 = vld [vmem:[#allocation5 + $0x48] sm:$0xff]  ;;  %v1534_v44 = vld [vmem:[#allocation5 + $0xb0] sm:$0xf]  ;;  %v1593_v0 = vld [vmem:[%s3918_s7 + $0x20] sm:$0xff] }
 0x11a   : > { %v1057_v19 = vadd.f32 %v1049_v47, %v1045_v15  ;;  %v1056_v20 = vadd.f32 %v1048_v45, %v1044_v43  ;;  %v2643_v47 = vld [vmem:[#allocation5 + $0x8] sm:$0xff]  ;;  %v1500_v2 = vpack.c.b16 %v1495_v1, %v1495_v1  ;;  %v2655_v43 = vld [vmem:[#allocation5 + $0x74] sm:$0xff]  ;;  %v1553_v15 = vunpack.c.l.b16 %v1534_v44  ;;  %v2487_v1 = vld [vmem:[%s3918_s7 + $0xa0] sm:$0xff] }
 0x11b   : > { %1399 = vmatpush.bf16.msrb.mxu2 %v2643_v47  ;;  %v2646_v16 = vld [vmem:[#allocation5 + $0x24] sm:$0xff]  ;;  %v2497_v47 = vld [vmem:[%s3918_s7 + $0xf0] sm:$0xff] }
 0x11c   : > { %v1063_v21 = vmax.f32 %v1057_v19, 0.0  ;;  %v1062_v22 = vmax.f32 %v1056_v20, 0.0  ;;  %v1509_v4 = vsel %vm1343_vm6, %v1500_v2, 0  ;;  %v1558_v19 = vpack.c.b16 %v1553_v15, %v1553_v15  ;;  %v2654_v20 = vld [vmem:[#allocation5 + $0x6c] sm:$0xff]  ;;  %v1592_v2 = vld [vmem:[%s3918_s7 + $0x18] sm:$0xff] }
 0x11d   : > { %v939_v23 = vpop.f32.mrf.mxu2  ;;  %v957_v25 = vpop.f32.mrf.mxu3  ;;  %1514 = vmatpush.bf16.msra.mxu0 %v1509_v4 }
 0x11e   : > { %1114 = vmatmul.f32.gmra.mxu2 %v1062_v22  ;;  %2370 = vmatmul.msk.f32.gmra.mxu3 %vm1082_vm5, %v1063_v21  ;;  %v2660_v23 = vld [vmem:[#allocation5 + $0xa0] sm:$0xff]  ;;  %v2659_v25 = vld [vmem:[#allocation5 + $0x98] sm:$0xff] }
 0x11f   : > { %1185 = vmatmul.f32.gmra.mxu0 %v1062_v22  ;;  %1400 = vmatpush.bf16.msrb.mxu2 %v2642_v5  ;;  %v2661_v22 = vld [vmem:[#allocation5 + $0xa8] sm:$0xff] }
 0x120   : > { %v1591_v5 = vld [vmem:[%s3918_s7 + $0x10] sm:$0xff] }
 0x121   : > { %1515 = vmatpush.bf16.msra.mxu0 %v2657_v8  ;;  %v2484_v8 = vld [vmem:[%s3918_s7 + $0x88] sm:$0xff] }
 0x125   : > { %1516 = vmatpush.bf16.msra.mxu0 %v2656_v11 }
 0x126   : > { %2389 = vmatmul.msk.f32.vlgmr.msra.gmra.mxu2 %vm1082_vm5, %v1059_v58 }
 0x129   : > { %1517 = vmatpush.bf16.msra.mxu0 %v2655_v43 }
 0x12d   : > { %1518 = vmatpush.bf16.msra.mxu0 %v2654_v20 }
 0x12e   : > { %2390 = vmatmul.msk.f32.gmra.mxu2 %vm1082_vm5, %v1061_v7  ;;  %v2652_v7 = vld [vmem:[#allocation5 + $0x58] sm:$0xff] }
 0x136   : > { %2391 = vmatmul.msk.f32.gmra.mxu2 %vm1082_vm5, %v1063_v21  ;;  %v1567_v21 = vsel %vm1343_vm6, %v1558_v19, 0 }
 0x18c   : > { %v1180_v33 = vpop.f32.mrf.mxu0 }
 0x191   : > { %v1109_v24 = vpop.f32.mrf.mxu2  ;;  %v1135_v32 = vpop.f32.mrf.mxu3 }
 0x192   : > { %v1136_v57 = vadd.f32 %v1135_v32, %v1109_v24 }
 0x194   : > { %v1183_v38 = vpop.f32.mrf.mxu0 }
 0x199   : > { %v1112_v30 = vpop.f32.mrf.mxu2  ;;  %v1138_v36 = vpop.f32.mrf.mxu3 }
 0x19a   : > { %v1139_v27 = vadd.f32 %v1138_v36, %v1112_v30  ;;  %v2658_v30 = vld [vmem:[#allocation5 + $0x90] sm:$0xff] }
 0x19c   : > { %v1186_v42 = vpop.f32.mrf.mxu0 }
 0x1a1   : > { %v1115_v31 = vpop.f32.mrf.mxu2  ;;  %v1141_v41 = vpop.f32.mrf.mxu3 }
 0x1a2   : > { %v1142_v51 = vadd.f32 %v1141_v41, %v1115_v31 }
 0x1a9   : > { %v1206_v34 = vpop.f32.mrf.mxu2 }
 0x1aa   : > { %v1207_v53 = vadd.f32 %v1206_v34, %v1180_v33 }
 0x1ac   : > { %v1215_v59 = vmax.f32 %v1136_v57, %v1207_v53  ;;  %v2494_v53 = vld [vmem:[%s3918_s7 + $0xd8] sm:$0xff]  ;;  %v2492_v57 = vld [vmem:[%s3918_s7 + $0xc8] sm:$0xff] }
 0x1b1   : > { %v1209_v40 = vpop.f32.mrf.mxu2 }
 0x1b2   : > { %v1210_v26 = vadd.f32 %v1209_v40, %v1183_v38 }
 0x1b4   : > { %v1216_v58 = vmax.f32 %v1139_v27, %v1210_v26  ;;  %v1601_v26 = vld [vmem:[%s3918_s7 + $0x60] sm:$0xff]  ;;  %v1600_v27 = vld [vmem:[%s3918_s7 + $0x58] sm:$0xff] }
 0x1b9   : > { %v1212_v45 = vpop.f32.mrf.mxu2 }
 0x1ba   : > { %v1213_v52 = vadd.f32 %v1212_v45, %v1186_v42  ;;  %v1604_v42 = vld [vmem:[%s3918_s7 + $0x78] sm:$0xff] }
 0x1bb   : > { %v2498_v45 = vld [vmem:[%s3918_s7 + $0xf8] sm:$0xff]  ;;  %1605 = vmatpush.msra.mxu2 %v1604_v42  ;;  %v2666_v42 = vld [vmem:[#allocation10 + $0x20] sm:$0xff] }
 0x1bc   : > { %v1217_v54 = vmax.f32 %v1142_v51, %v1213_v52  ;;  %v2496_v51 = vld [vmem:[%s3918_s7 + $0xe8] sm:$0xff]  ;;  %v2495_v52 = vld [vmem:[%s3918_s7 + $0xe0] sm:$0xff] }
 0x1bd   : > { %1606 = vmatpush.msra.mxu2 %v1603_v46  ;;  %v2677_v46 = vld [vmem:[#allocation10 + $0x78] sm:$0xff] }
 0x1be   : > { %1240 = vmatpush.msra.mxu3 %v1217_v54  ;;  %1272 = vmatpush.msrb.mxu1 %v1217_v54  ;;  %v1599_v54 = vld [vmem:[%s3918_s7 + $0x50] sm:$0xff] }
 0x1bf   : > { %1607 = vmatpush.msra.mxu2 %v1602_v48  ;;  %v2675_v48 = vld [vmem:[#allocation10 + $0x68] sm:$0xff] }
 0x1c0   : > { %1241 = vmatpush.msra.mxu3 %v1216_v58  ;;  %1273 = vmatpush.msrb.mxu1 %v1216_v58  ;;  %v1597_v58 = vld [vmem:[%s3918_s7 + $0x40] sm:$0xff] }
 0x1c1   : > { %1608 = vmatpush.msra.mxu2 %v1601_v26  ;;  %v1936_v26 = vld [vmem:[%s3922_s11 + $0x38] sm:$0xf] }
 0x1c2   : > { %1242 = vmatpush.msra.mxu3 %v1215_v59  ;;  %1274 = vmatpush.msrb.mxu1 %v1215_v59  ;;  %v2491_v59 = vld [vmem:[%s3918_s7 + $0xc0] sm:$0xff] }
 0x1c3   : > { %2392 = vmatmul.msk.f32.vlgmr.msra.gmra.mxu3 %vm1220_vm7, %v1218_v60  ;;  %2396 = vmatmul.msk.f32.vlgmr.msrb.gmra.mxu1 %vm1220_vm7, %v2394_v61  ;;  %v1596_v60 = vld [vmem:[%s3918_s7 + $0x38] sm:$0xff] }
 0x1c4   : > { %1454 = vmatpush.bf16.msra.mxu1 %v1449_v62  ;;  %1350 = vmatpush.bf16.msrb.mxu3 %v1345_v63  ;;  %v2490_v61 = vld [vmem:[%s3918_s7 + $0xb8] sm:$0xff]  ;;  %v1595_v62 = vld [vmem:[%s3918_s7 + $0x30] sm:$0xff] }
 0x1c5   : > { %1609 = vmatpush.msra.mxu2 %v1600_v27  ;;  %v2489_v63 = vld [vmem:[%s3918_s7 + $0xb0] sm:$0xff]  ;;  %v1967_v27 = vunpack.c.l.b16 %v1936_v26 }
 0x1c7   : > { %1610 = vmatpush.msra.mxu2 %v1599_v54 }
 0x1c8   : > { %1455 = vmatpush.bf16.msra.mxu1 %v2653_v3  ;;  %1351 = vmatpush.bf16.msrb.mxu3 %v2649_v6  ;;  %v2486_v3 = vld [vmem:[%s3918_s7 + $0x98] sm:$0xff]  ;;  %v2485_v6 = vld [vmem:[%s3918_s7 + $0x90] sm:$0xff] }
 0x1c9   : > { %1611 = vmatpush.msra.mxu2 %v1598_v56 }
 0x1cb   : > { %2393 = vmatmul.msk.f32.gmra.mxu3 %vm1220_vm7, %v1219_v49  ;;  %2397 = vmatmul.msk.f32.gmra.mxu1 %vm1220_vm7, %v2395_v50  ;;  %v1594_v49 = vld [vmem:[%s3918_s7 + $0x28] sm:$0xff] }
 0x1cc   : > { %1456 = vmatpush.bf16.msra.mxu1 %v2652_v7  ;;  %1352 = vmatpush.bf16.msrb.mxu3 %v2648_v9  ;;  %v2488_v50 = vld [vmem:[%s3918_s7 + $0xa8] sm:$0xff]  ;;  %v1589_v9 = vld [vmem:[%s3918_s7] sm:$0xff] }
 0x1cd   : > { %1612 = vmatpush.msra.mxu2 %v1597_v58  ;;  %v1590_v7 = vld [vmem:[%s3918_s7 + $0x8] sm:$0xff] }
 0x1cf   : > { %1613 = vmatpush.msra.mxu2 %v1596_v60 }
 0x1d0   : > { %1457 = vmatpush.bf16.msra.mxu1 %v2651_v10  ;;  %1353 = vmatpush.bf16.msrb.mxu3 %v2647_v12  ;;  %v2483_v10 = vld [vmem:[%s3918_s7 + $0x80] sm:$0xff] }
 0x1d1   : > { %1614 = vmatpush.msra.mxu2 %v1595_v62  ;;  %v2683_v62 = vld [vmem:[%s3922_s11 + $0x28] sm:$0xff] }
 0x1d3   : > { %1615 = vmatpush.msra.mxu2 %v1594_v49  ;;  %v2681_v49 = vld [vmem:[%s3922_s11 + $0x18] sm:$0xff] }
 0x1d4   : > { %1458 = vmatpush.bf16.msra.mxu1 %v2650_v14  ;;  %1354 = vmatpush.bf16.msrb.mxu3 %v2646_v16 }
 0x1d5   : > { %1616 = vmatpush.msra.mxu2 %v1593_v0  ;;  %v2679_v0 = vld [vmem:[%s3922_s11 + $0x8] sm:$0xff] }
 0x1d7   : > { %1617 = vmatpush.msra.mxu2 %v1592_v2 }
 0x1d8   : > { %1572 = vmatpush.bf16.msra.mxu3 %v1567_v21  ;;  %1642 = vmatpush.msrb.mxu1 %v2498_v45  ;;  %v2670_v45 = vld [vmem:[#allocation10 + $0x40] sm:$0xff] }
 0x1d9   : > { %1618 = vmatpush.msra.mxu2 %v1591_v5 }
 0x1da   : > { %1643 = vmatpush.msrb.mxu1 %v2497_v47  ;;  %v2676_v47 = vld [vmem:[#allocation10 + $0x70] sm:$0xff] }
 0x1db   : > { %1619 = vmatpush.msra.mxu2 %v1590_v7  ;;  %v2689_v7 = vld [vmem:[#allocation14 + $0x20] sm:$0xff] }
 0x1dc   : > { %1573 = vmatpush.bf16.msra.mxu3 %v2661_v22  ;;  %1644 = vmatpush.msrb.mxu1 %v2496_v51  ;;  %v2826_v22 = vld [vmem:[#allocation7] ss:$0 sm:$0xff]  ;;  %v2674_v51 = vld [vmem:[#allocation10 + $0x60] sm:$0xff] }
 0x1dd   : > { %1620 = vmatpush.msra.mxu2 %v1589_v9 }
 0x1de   : > { %1645 = vmatpush.msrb.mxu1 %v2495_v52 }
 0x1e0   : > { %1574 = vmatpush.bf16.msra.mxu3 %v2660_v23  ;;  %1646 = vmatpush.msrb.mxu1 %v2494_v53  ;;  %v1975_v53 = vpack.c.b16 %v1967_v27, %v1967_v27 }
 0x1e2   : > { %1647 = vmatpush.msrb.mxu1 %v2493_v55  ;;  %v1988_v54 = vsel %vm1343_vm6, %v1975_v53, 0 }
 0x1e4   : > { %1575 = vmatpush.bf16.msra.mxu3 %v2659_v25  ;;  %1648 = vmatpush.msrb.mxu1 %v2492_v57 }
 0x1e6   : > { %1649 = vmatpush.msrb.mxu1 %v2491_v59 }
 0x1e8   : > { %1576 = vmatpush.bf16.msra.mxu3 %v2658_v30  ;;  %1650 = vmatpush.msrb.mxu1 %v2490_v61  ;;  %v2684_v61 = vld [vmem:[%s3922_s11 + $0x30] sm:$0xff] }
 0x1ea   : > { %1651 = vmatpush.msrb.mxu1 %v2489_v63  ;;  %v2682_v63 = vld [vmem:[%s3922_s11 + $0x20] sm:$0xff] }
 0x1ec   : > { %1652 = vmatpush.msrb.mxu1 %v2488_v50  ;;  %v2680_v50 = vld [vmem:[%s3922_s11 + $0x10] sm:$0xff] }
 0x1ee   : > { %1653 = vmatpush.msrb.mxu1 %v2487_v1  ;;  %v2678_v1 = vld [vmem:[%s3922_s11] sm:$0xff] }
 0x1f0   : > { %1654 = vmatpush.msrb.mxu1 %v2486_v3  ;;  %v2015_v3 = vld [vmem:[#allocation14 + $0x28] sm:$0x3] }
 0x1f2   : > { %1655 = vmatpush.msrb.mxu1 %v2485_v6 }
 0x1f4   : > { %1656 = vmatpush.msrb.mxu1 %v2484_v8 }
 0x1f6   : > { %1657 = vmatpush.msrb.mxu1 %v2483_v10 }
 0x240   : > { %v1276_v24 = vpop.f32.mrf.mxu1 }
 0x246   : > { %v1244_v31 = vpop.f32.mrf.mxu3 }
 0x247   : > { %v1282_v32 = vmax.f32 %v1244_v31, %v1276_v24 }
 0x248   : > { %v1279_v34 = vpop.f32.mrf.mxu1 }
 0x249   : > { %v1284_v33 = vpack.c.bf16 %v1282_v32, %v1282_v32 }
 0x24b   : > { %2431 = vmatmul.msk.bf16.vlgmr.msrb.gmra.mxu2 %vm1339_vm8, %v1284_v33 }
 0x24e   : > { %v1247_v13 = vpop.f32.mrf.mxu3 }
 0x24f   : > { %v1283_v35 = vmax.f32 %v1247_v13, %v1279_v34  ;;  %v1663_v13 = vld [vmem:[#allocation8] sm:$0xf] }
 0x251   : > { %v1294_v36 = vpack.c.bf16 %v1283_v35, %v1282_v32  ;;  %v1689_v35 = vld [vmem:[#allocation8 + $0x4] sm:$0xf] }
 0x253   : > { %v1306_v37 = vshrl.u32 %v1294_v36, 16  ;;  %v1308_v38 = vshll.u32 %v1294_v36, 16  ;;  %v1417_v39 = vrot.slane %v1294_v36, 1  ;;  %v1535_v41 = vrot.slane %v1294_v36, 2  ;;  %v2665_v36 = vld [vmem:[#allocation10 + $0x18] sm:$0xff] }
 0x255   : > { %v1310_v40 = vrot.slane %v1308_v38, 1  ;;  %v1475_v17 = vrot.slane %v1306_v37, 1  ;;  %v1476_v18 = vrot.slane %v1308_v38, 2  ;;  %2448 = vmatmul.msk.bf16.vlgmr.msra.gmra.mxu1 %vm1339_vm8, %v1417_v39  ;;  %v2673_v38 = vld [vmem:[#allocation10 + $0x58] sm:$0xff]  ;;  %v2664_v39 = vld [vmem:[#allocation10 + $0x10] sm:$0xff] }
 0x256   : > { %1857 = vmatpush.bf16.msrb.mxu2 %v2673_v38  ;;  %1990 = vmatpush.bf16.msra.mxu1 %v1988_v54 }
 0x257   : > { %v1311_v28 = vor.u32 %v1310_v40, %v1306_v37  ;;  %v1477_v29 = vor.u32 %v1476_v18, %v1475_v17  ;;  %v2669_v37 = vld [vmem:[#allocation10 + $0x38] sm:$0xff]  ;;  %v2668_v40 = vld [vmem:[#allocation10 + $0x30] sm:$0xff]  ;;  %v2663_v18 = vld [vmem:[#allocation10 + $0x8] sm:$0xff] }
 0x258   : > { %v2672_v17 = vld [vmem:[#allocation10 + $0x50] sm:$0xff] }
 0x259   : > { %2414 = vmatmul.msk.bf16.vlgmr.msrb.gmra.mxu3 %vm1339_vm8, %v1311_v28  ;;  %2465 = vmatmul.msk.bf16.vlgmr.msra.gmra.mxu0 %vm1339_vm8, %v1477_v29  ;;  %v2667_v28 = vld [vmem:[#allocation10 + $0x28] sm:$0xff] }
 0x25a   : > { %1767 = vmatpush.bf16.msrb.mxu3 %v2669_v37  ;;  %1858 = vmatpush.bf16.msrb.mxu2 %v2672_v17  ;;  %v2671_v29 = vld [vmem:[#allocation10 + $0x48] sm:$0xff] }
 0x25b   : > { %1991 = vmatpush.bf16.msra.mxu1 %v2684_v61 }
 0x25e   : > { %1768 = vmatpush.bf16.msrb.mxu3 %v2668_v40  ;;  %1859 = vmatpush.bf16.msrb.mxu2 %v2671_v29 }
 0x25f   : > { %1992 = vmatpush.bf16.msra.mxu1 %v2683_v62 }
 0x262   : > { %1769 = vmatpush.bf16.msrb.mxu3 %v2667_v28  ;;  %1860 = vmatpush.bf16.msrb.mxu2 %v2670_v45 }
 0x263   : > { %1993 = vmatpush.bf16.msra.mxu1 %v2682_v63 }
 0x266   : > { %1770 = vmatpush.bf16.msrb.mxu3 %v2666_v42 }
 0x267   : > { %1994 = vmatpush.bf16.msra.mxu1 %v2681_v49 }
 0x269   : > { %2482 = vmatmul.msk.bf16.vlgmr.msra.gmra.mxu3 %vm1339_vm8, %v1535_v41  ;;  %v2662_v41 = vld [vmem:[#allocation10] sm:$0xff] }
 0x26a   : > { %1908 = vmatpush.bf16.msra.mxu3 %v2677_v46 }
 0x26b   : > { %1995 = vmatpush.bf16.msra.mxu1 %v2680_v50 }
 0x26e   : > { %1909 = vmatpush.bf16.msra.mxu3 %v2676_v47 }
 0x26f   : > { %1996 = vmatpush.bf16.msra.mxu1 %v2679_v0 }
 0x272   : > { %1910 = vmatpush.bf16.msra.mxu3 %v2675_v48 }
 0x273   : > { %1997 = vmatpush.bf16.msra.mxu1 %v2678_v1 }
 0x276   : > { %1911 = vmatpush.bf16.msra.mxu3 %v2674_v51 }
 0x2ce   : > { %v1402_v4 = vpop.f32.mrf.mxu2 }
 0x2d2   : > { %v1460_v11 = vpop.f32.mrf.mxu1 }
 0x2d6   : > { %v1404_v12 = vpop.f32.mrf.mxu2  ;;  %v1520_v14 = vpop.f32.mrf.mxu0 }
 0x2d7   : > { %v2687_v12 = vld [vmem:[#allocation14 + $0x10] sm:$0xff] }
 0x2da   : > { %v1462_v43 = vpop.f32.mrf.mxu1 }
 0x2dc   : > { %v1356_v44 = vpop.f32.mrf.mxu3 }
 0x2dd   : > { %v1403_v16 = vadd.f32 %v1402_v4, %v1356_v44  ;;  %v2038_v4 = vunpack.c.l.b16 %v2015_v3 }
 0x2de   : > { %v1522_v15 = vpop.f32.mrf.mxu0 }
 0x2df   : > { %v1464_v20 = vadd.f32 %v1460_v11, %v1403_v16  ;;  %v2044_v5 = vpack.c.b16 %v2038_v4, %v2038_v4  ;;  %v2688_v11 = vld [vmem:[#allocation14 + $0x18] sm:$0xff] }
 0x2e1   : > { %v1524_v21 = vadd.f32 %v1520_v14, %v1464_v20  ;;  %v2056_v6 = vsel %vm2054_vm11, %v2044_v5, 0 }
 0x2e4   : > { %v1358_v19 = vpop.f32.mrf.mxu3 }
 0x2e5   : > { %v1918_v19 = vld [vmem:[#allocation11] sm:$0x1] }
 0x2ec   : > { %v1578_v23 = vpop.f32.mrf.mxu3 }
 0x2ed   : > { %v1582_v25 = vadd.f32 %v1578_v23, %v1524_v21 }
 0x2ef   : > { %v1587_v24 = vadd.f32 %v2826_v22, %v1582_v25 }
 0x2f1   : > { %v1588_v30 = vmax.f32 %v1587_v24, 0.0  ;;  %v2686_v24 = vld [vmem:[#allocation14 + $0x8] sm:$0xff] }
 0x2f3   : > { %1621 = vmatmul.f32.vlgmr.msra.gmra.mxu2 %v1588_v30  ;;  %1658 = vmatmul.f32.vlgmr.msrb.gmra.mxu1 %v1588_v30  ;;  %v2685_v30 = vld [vmem:[#allocation14] sm:$0xff] }
 0x2f4   : > { %v1580_v31 = vpop.f32.mrf.mxu3 }
 0x2f5   : > { %v1937_v31 = vld [vmem:[#allocation13] sm:$0x1] }
 0x370   : > { %v1659_v32 = vpop.f32.mrf.mxu1 }
 0x376   : > { %v1622_v33 = vpop.f32.mrf.mxu2 }
 0x377   : > { %v1662_v34 = vmax.f32 %v1622_v33, %v1659_v32 }
 0x379   : > { %1683 = vmatpush.msrb.mxu0 %v1662_v34 }
 0x37a   : > { %2499 = vmatmul.msk.f32.vlgmr.msrb.gmra.mxu0 %vm1664_vm9, %v1663_v13 }
 0x37b   : > { %1708 = vmatpush.msra.mxu0 %v1662_v34 }
 0x37d   : > { %1806 = vmatpush.bf16.msrb.mxu0 %v2665_v36  ;;  %v2016_v36 = vld [vmem:[#allocation16] sm:$0x1] }
 0x381   : > { %1807 = vmatpush.bf16.msrb.mxu0 %v2664_v39 }
 0x382   : > { %2500 = vmatmul.msk.f32.vlgmr.msra.gmra.mxu0 %vm1664_vm9, %v1689_v35 }
 0x385   : > { %1808 = vmatpush.bf16.msrb.mxu0 %v2663_v18 }
 0x389   : > { %1809 = vmatpush.bf16.msrb.mxu0 %v2662_v41 }
 0x38d   : > { %2060 = vmatpush.bf16.msra.mxu0 %v2056_v6 }
 0x391   : > { %2061 = vmatpush.bf16.msra.mxu0 %v2689_v7 }
 0x395   : > { %2062 = vmatpush.bf16.msra.mxu0 %v2688_v11 }
 0x399   : > { %2063 = vmatpush.bf16.msra.mxu0 %v2687_v12 }
 0x39d   : > { %2064 = vmatpush.bf16.msra.mxu0 %v2686_v24 }
 0x3a1   : > { %2065 = vmatpush.bf16.msra.mxu0 %v2685_v30 }
 0x3f7   : > { %v1685_v52 = vpop.f32.mrf.mxu0 }
 0x3ff   : > { %v1710_v55 = vpop.f32.mrf.mxu0 }
 0x400   : > { %v1713_v56 = vmax.f32 %v1685_v52, %v1710_v55 }
 0x402   : > { %v1714_v57 = vpack.c.bf16 %v1713_v56, %v1713_v56 }
 0x404   : > { %v1733_v58 = vshrl.u32 %v1714_v57, 16  ;;  %v1825_v59 = vrot.slane %v1714_v57, 1  ;;  %2534 = vmatmul.msk.bf16.vlgmr.msrb.gmra.mxu0 %vm1759_vm10, %v1714_v57 }
 0x406   : > { %2517 = vmatmul.msk.bf16.vlgmr.msrb.gmra.mxu3 %vm1759_vm10, %v1733_v58  ;;  %2551 = vmatmul.msk.bf16.vlgmr.msrb.gmra.mxu2 %vm1759_vm10, %v1825_v59  ;;  %v1876_v60 = vrot.slane %v1733_v58, 1 }
 0x416   : > { %2568 = vmatmul.msk.bf16.vlgmr.msra.gmra.mxu3 %vm1759_vm10, %v1876_v60 }
 0x481   : > { %v1811_v2 = vpop.f32.mrf.mxu0 }
 0x489   : > { %v1772_v8 = vpop.f32.mrf.mxu3  ;;  %v1813_v9 = vpop.f32.mrf.mxu0 }
 0x48a   : > { %v1862_v10 = vpop.f32.mrf.mxu2  ;;  %v1812_v44 = vadd.f32 %v1811_v2, %v1772_v8 }
 0x48c   : > { %v1866_v15 = vadd.f32 %v1862_v10, %v1812_v44 }
 0x491   : > { %v1774_v14 = vpop.f32.mrf.mxu3 }
 0x492   : > { %v1864_v43 = vpop.f32.mrf.mxu2 }
 0x499   : > { %v1913_v16 = vpop.f32.mrf.mxu3 }
 0x49a   : > { %v1917_v20 = vadd.f32 %v1913_v16, %v1866_v15 }
 0x49c   : > { %v1919_v21 = vadd.f32 %v1918_v19, %v1917_v20 }
 0x49e   : > { %v1920_v22 = vmax.f32 %v1919_v21, 0.0 }
 0x4a0   : > { %v1921_v23 = vpack.c.bf16 %v1920_v22, %v1920_v22 }
 0x4a1   : > { %v1915_v25 = vpop.f32.mrf.mxu3 }
 0x4a2   : > { %2597 = vmatmul.msk.bf16.vlgmr.msra.gmra.mxu1 %vm1983_vm12, %v1921_v23 }
 0x51f   : > { %v1999_v32 = vpop.f32.mrf.mxu1 }
 0x520   : > { %v2000_v33 = vadd.f32 %v1999_v32, %v1937_v31 }
 0x522   : > { %v2003_v34 = vmax.f32 %v2000_v33, 0.0 }
 0x524   : > { %v2004_v13 = vpack.c.bf16 %v2003_v34, %v2003_v34 }
 0x526   : > { %2618 = vmatmul.msk.bf16.vlgmr.msra.gmra.mxu0 %vm2050_vm13, %v2004_v13 }
 0x527   : > { %v2001_v35 = vpop.f32.mrf.mxu1 }
 0x5a3   : > { %v2067_v37 = vpop.f32.mrf.mxu0 }
 0x5a4   : > { %v2068_v38 = vadd.f32 %v2067_v37, %v2016_v36 }
 0x5a6   : > { %2071 = vst [vmem:[%s625_s18] sm:$0x1] %v2068_v38 }
 0x5a7   : > { %3124 = shalt.err (!%p3121_p8)
}
 0x5a8   : > { %2730 = dma.vmem_to_hbm [thread:$0]  (%p3310_p5), %s2084_s29, 16, %s2086_s23, %s2073_s26  }
 0x5ab   : > { %v2069_v39 = vpop.f32.mrf.mxu0 }
 0x5ac PF: > { %s3956_s3 = sld [smem:[#allocation26_spill]] }
 0x5ad   : > { %s3957_s15 = sld [smem:[#allocation24_spill]] }
 0x5b2   : > { %p2782_p9 = scmp.ge.s32.totalorder %s3956_s3, 2 }
 0x5b3   : > { %s2097_s20 = sand.u32 1, %s3957_s15  }
 0x5b4   : > { %p2761_p10 = pnand %p2782_p9, %p3314_p6  ;;  %s2098_s24 = scalar_lea.sflag [#allocation4], %s2097_s20 }
 0x5b6   : > { %p2762_p11 = pneg %p2761_p10 }
 0x5b8   : > { %3162 = dma.done.wait (%p2762_p11), %s2098_s24, 16  }
 0x5b9   : > { %3164 = vsyncadd (%p2762_p11), %s2098_s24, 4294967280  ;;  %s3959_s21 = sld [smem:[#allocation27_spill]]  ;;  %s3962_s18 = smov %s3171_s19 }
 0x5ba   : > { %s3960_s27 = sld [smem:[#allocation25_spill]] }
 0x5bb   : > { %s3961_s20 = sld [smem:[#allocation28_spill]] }
 0x5bf   : > { %p30_p12 = scmp.ge.s32.totalorder %s3959_s21, 4  }
 0x5c0   : > { %s3963_s19 = smov %s3960_s27 }
 0x5c1   :  { %32 = sbr.rel (!%p30_p12) target bundleno = 13 (0xd), region = 167 }
 0x5c6   :  { %2103 = vsyncpa [#allocation3], 1 }
 0x5c7   :  { %2105 = vsyncpa [#allocation3 + $0x1], 1 }
 0x5c8   :  { %2106 = vsyncpa [#allocation6], 1 }
 0x5c9   :  { %2107 = vsyncpa [#allocation9], 1 }
 0x5ca   :  { %2108 = vsyncpa [#allocation12], 1 }
 0x5cb   :  { %2109 = vsyncpa [#allocation15], 1 }
 0x5cc   :  { %2110 = vsyncpa [#allocation4], 1 }
 0x5cd   :  { %2112 = vsyncpa [#allocation4 + $0x1], 1 }

</bundles_post_ra>
